<compile_context>
chip_gen: v7x
topology: tpu7x:2x2x1
jax: 0.10.0
libtpu: 0.0.40
codegen_flags: <defaults>
</compile_context>

<pallas_src>
import functools

import jax
import jax.numpy as jnp
from jax.experimental import pallas as pl
from jax.experimental.pallas import tpu as pltpu

NUM_NODE_TYPES = 30
LANE = 128  # padded feature width (lane-dense)


def _gcn_kernel(tm, adj_resident, x_ref, a_ref, w_ref, b_ref, pool_ref, out_ref, hbuf):
    """grid = (phase, m): phase 0 loads embeddings, phases 1..3 are the GCN layers."""
    l = pl.program_id(0)
    m = pl.program_id(1)
    nm = pl.num_programs(1)
    row = pl.multiple_of(m * tm, tm)
    f32 = jnp.float32
    bf16 = jnp.bfloat16

    # ---- phase 0: stream the gathered embeddings into feature buffer 0
    @pl.when(l == 0)
    def _():
        hbuf[0, pl.ds(row, tm), :] = x_ref[...]

    # ---- phases 1..3: one GCN layer per phase, one output row block per step
    @pl.when(l > 0)
    def _():
        p_in = 1 - (l % 2)                     # layers 1,3 read buf 0; layer 2 reads buf 1
        h_in = hbuf[p_in]                      # (n_pad, LANE) bf16, full previous features

        if adj_resident:
            a_blk = a_ref[pl.ds(row, tm), :]   # slice rows of the VMEM-resident A_hat
        else:
            a_blk = a_ref[...]                 # streamed (tm, n_pad) row block

        # full-K aggregation in a single MXU dot, then the hoisted weight matmul + bias
        z = jnp.dot(a_blk, h_in, preferred_element_type=f32)                   # (tm, LANE)
        h = jnp.dot(z.astype(bf16), w_ref[0], preferred_element_type=f32) + b_ref[0]

        h_relu = jnp.maximum(h, 0.0).astype(bf16)
        h_lin = h.astype(bf16)

        @pl.when(l == 1)
        def _():
            hbuf[1, pl.ds(row, tm), :] = h_relu

        @pl.when(l == 2)
        def _():
            hbuf[0, pl.ds(row, tm), :] = h_relu

        @pl.when(l == 3)
        def _():
            hbuf[1, pl.ds(row, tm), :] = h_lin

            # finalize once, after the last row block of the last layer:
            # mean-pool + L2-normalize and write the lane-dense output block.
            @pl.when(m == nm - 1)
            def _():
                hf = hbuf[1].astype(f32)                                        # (n_pad, LANE)
                pooled = jnp.dot(pool_ref[...], hf, preferred_element_type=f32)  # (G_pad, LANE)
                ssq = jnp.sum(pooled * pooled, axis=1, keepdims=True)
                # matches x / torch.norm(x, dim=1) except the degenerate all-zero row
                # (torch would produce NaN there).
                out_ref[...] = pooled * jax.lax.rsqrt(jnp.maximum(ssq, 1e-24))


def _vmem_limit_bytes():
    # ~75% of physical VMEM (≈96 MiB on v5e/v6e, ≈48 MiB on v7x); safe fallback 48 MiB.
    try:
        return int(pltpu.get_tpu_info().vmem_capacity_bytes) * 3 // 4
    except Exception:
        return 48 * 1024 * 1024


def geometric_embedding(node_ids, edge_index, batch, num_graphs, params, *, tm=256):
    """node_ids: [N] int32 in [0,30); edge_index: [2,E] int32; batch: [N] int32.

    tm: node-row tile. 256 fits every generation; raise to 512-1024 on v5e/v6e
    (128 MiB VMEM) for large graphs, keep ~256 on v7x (64 MiB VMEM).
    """
    N = node_ids.shape[0]
    D = params["emb"].shape[1]
    assert D <= LANE
    n_pad = ((N + tm - 1) // tm) * tm
    nm = n_pad // tm
    G_pad = ((num_graphs + 7) // 8) * 8

    # --- embedding lookup: direct gather, pad to lane-dense width, bf16 (MXU operand)
    x = params["emb"][node_ids].astype(jnp.float32)
    x = jnp.pad(x, ((0, n_pad - N), (0, LANE - D))).astype(jnp.bfloat16)    # (n_pad, LANE)

    # --- symmetric-normalized adjacency with self loops, computed ONCE here (XLA),
    #     stored bf16: no per-step normalization work inside the kernel.
    src, dst = edge_index[0], edge_index[1]
    diag = jnp.arange(N)
    adj = jnp.zeros((n_pad, n_pad), jnp.float32)
    adj = adj.at[dst, src].add(1.0)
    adj = adj.at[diag, diag].add(1.0)
    deg = jnp.zeros((n_pad,), jnp.float32).at[dst].add(1.0).at[diag].add(1.0)
    dinv = jnp.where(deg > 0, jax.lax.rsqrt(deg), 0.0)
    a_hat = (dinv[:, None] * adj * dinv[None, :]).astype(jnp.bfloat16)       # (n_pad, n_pad)

    # --- mean-pool matrix (G_pad, n_pad); padded nodes get batch=-1 -> zero pool weight
    batch_pad = jnp.concatenate([batch.astype(jnp.int32),
                                 jnp.full((n_pad - N,), -1, jnp.int32)])
    onehot_b = jax.nn.one_hot(batch_pad, G_pad, dtype=jnp.float32)           # (n_pad, G_pad)
    counts = onehot_b.sum(axis=0)
    pool = onehot_b.T / jnp.maximum(counts, 1.0)[:, None]                    # (G_pad, n_pad)

    # --- weights / biases padded to LANE and stacked over the 3 layers
    def pad_w(w):
        return jnp.pad(w, ((0, LANE - D), (0, LANE - D)))

    def pad_b(b):
        return jnp.pad(b, ((0, 0), (0, LANE - D)))

    W = jnp.stack([pad_w(params["w1"]), pad_w(params["w2"]),
                   pad_w(params["w3"])]).astype(jnp.bfloat16)                # (3, LANE, LANE)
    B = jnp.stack([pad_b(params["b1"]), pad_b(params["b2"]),
                   pad_b(params["b3"])]).astype(jnp.float32)                 # (3, 1, LANE)

    # Keep A_hat fully VMEM-resident across the 3 layers when its (double-buffered)
    # footprint fits a conservative budget -> 1 HBM pass over A instead of 3.
    adj_resident = (2 * n_pad * n_pad * 2) <= (24 << 20)
    if adj_resident:
        a_spec = pl.BlockSpec((n_pad, n_pad), lambda l, m: (0, 0))
    else:
        # during the load phase (l==0) keep fetching block 0 (it is reused at l==1,m==0)
        a_spec = pl.BlockSpec((tm, n_pad), lambda l, m: (jnp.where(l == 0, 0, m), 0))

    grid = (4, nm)  # phase 0 = load embeddings, phases 1..3 = GCN layers

    flops = int(3 * (2 * n_pad * n_pad * LANE + 2 * n_pad * LANE * LANE)
                + 2 * G_pad * n_pad * LANE)
    adj_bytes = n_pad * n_pad * 2 * (1 if adj_resident else 3)
    bytes_accessed = int(adj_bytes
                         + n_pad * LANE * 2          # embeddings (bf16), streamed once
                         + 3 * LANE * LANE * 2       # weights
                         + 3 * LANE * 4              # biases
                         + G_pad * n_pad * 4         # pool matrix
                         + G_pad * LANE * 4)         # output

    out = pl.pallas_call(
        functools.partial(_gcn_kernel, tm, adj_resident),
        out_shape=jax.ShapeDtypeStruct((G_pad, LANE), jnp.float32),
        grid_spec=pltpu.PrefetchScalarGridSpec(
            num_scalar_prefetch=0,
            grid=grid,
            in_specs=[
                # embeddings: streamed per row block during phase 0 only
                pl.BlockSpec((tm, LANE), lambda l, m: (jnp.where(l == 0, m, nm - 1), 0)),
                a_spec,
                pl.BlockSpec((1, LANE, LANE), lambda l, m: (jnp.maximum(l - 1, 0), 0, 0)),
                pl.BlockSpec((1, 1, LANE), lambda l, m: (jnp.maximum(l - 1, 0), 0, 0)),
                pl.BlockSpec((G_pad, n_pad), lambda l, m: (0, 0)),
            ],
            out_specs=pl.BlockSpec((G_pad, LANE), lambda l, m: (0, 0)),
            # ping-pong feature buffers (layer parity), bf16 to match MXU operand dtype
            scratch_shapes=[pltpu.VMEM((2, n_pad, LANE), jnp.bfloat16)],
        ),
        compiler_params=pltpu.CompilerParams(
            # layers are sequential and row blocks feed a shared scratch -> both arbitrary
            dimension_semantics=("arbitrary", "arbitrary"),
            vmem_limit_bytes=_vmem_limit_bytes()),
        cost_estimate=pl.CostEstimate(flops=flops, transcendentals=G_pad,
                                      bytes_accessed=bytes_accessed),
    )(x, a_hat, W, B, pool)

    return out[:num_graphs, :D]


def _reference(node_ids, edge_index, batch, num_graphs, params):
    """Pure-JAX f32 reference of the module forward."""
    N = node_ids.shape[0]
    x = params["emb"][node_ids].astype(jnp.float32)
    src, dst = edge_index[0], edge_index[1]
    diag = jnp.arange(N)
    adj = jnp.zeros((N, N), jnp.float32).at[dst, src].add(1.0).at[diag, diag].add(1.0)
    deg = jnp.zeros((N,), jnp.float32).at[dst].add(1.0).at[diag].add(1.0)
    dinv = jnp.where(deg > 0, jax.lax.rsqrt(deg), 0.0)
    ah = dinv[:, None] * adj * dinv[None, :]
    h = x
    for i, (w, b) in enumerate([(params["w1"], params["b1"]),
                                (params["w2"], params["b2"]),
                                (params["w3"], params["b3"])]):
        h = ah @ h @ w + b
        if i < 2:
            h = jnp.maximum(h, 0.0)
    onehot = jax.nn.one_hot(batch, num_graphs, dtype=jnp.float32)            # (N, G)
    pooled = (onehot.T @ h) / jnp.maximum(onehot.sum(axis=0), 1.0)[:, None]
    return pooled / jnp.linalg.norm(pooled, axis=1, keepdims=True)


def init_params(key, embedding_dim):
    ks = jax.random.split(key, 4)
    scale = 1.0 / jnp.sqrt(jnp.float32(embedding_dim))
    return {
        # nn.Embedding(30, D): N(0,1) init (frozen, deterministic here)
        "emb": jax.random.normal(ks[0], (NUM_NODE_TYPES, embedding_dim), jnp.float32),
        # GCNConv linear weights (glorot-ish) and zero biases; biases kept 2D (1,D)
        "w1": jax.random.normal(ks[1], (embedding_dim, embedding_dim), jnp.float32) * scale,
        "b1": jnp.zeros((1, embedding_dim), jnp.float32),
        "w2": jax.random.normal(ks[2], (embedding_dim, embedding_dim), jnp.float32) * scale,
        "b2": jnp.zeros((1, embedding_dim), jnp.float32),
        "w3": jax.random.normal(ks[3], (embedding_dim, embedding_dim), jnp.float32) * scale,
        "b3": jnp.zeros((1, embedding_dim), jnp.float32),
    }


if __name__ == "__main__":
    key = jax.random.PRNGKey(0)
    k_param, k_nodes, k_edges = jax.random.split(key, 3)

    embedding_dim = 32
    num_nodes = 16          # 2 graphs x 8 nodes
    num_graphs = 2
    num_edges = 24

    params = init_params(k_param, embedding_dim)

    node_ids = jax.random.randint(k_nodes, (num_nodes,), 0, NUM_NODE_TYPES, dtype=jnp.int32)
    # random edges within each graph's node block (src,dst), keeping graphs disjoint
    e_half = num_edges // 2
    e0 = jax.random.randint(k_edges, (2, e_half), 0, num_nodes // 2, dtype=jnp.int32)
    e1 = jax.random.randint(jax.random.fold_in(k_edges, 1), (2, e_half),
                            num_nodes // 2, num_nodes, dtype=jnp.int32)
    edge_index = jnp.concatenate([e0, e1], axis=1)
    batch = jnp.concatenate([
        jnp.zeros((num_nodes // 2,), jnp.int32),
        jnp.ones((num_nodes // 2,), jnp.int32),
    ])

    out = geometric_embedding(node_ids, edge_index, batch, num_graphs, params)
    out = jax.block_until_ready(out)
    assert out.shape == (num_graphs, embedding_dim)
    assert bool(jnp.all(jnp.isfinite(out)))

    # loose tolerance: kernel uses bf16 MXU operands / bf16 inter-layer storage
    ref = _reference(node_ids, edge_index, batch, num_graphs, params)
    err = float(jnp.max(jnp.abs(out - ref)))
    assert err < 5e-2, f"max abs err vs f32 reference: {err}"

    print("KERNEL_OK")
</pallas_src>

<mosaic_0001>
module attributes {stable_mosaic.version = 11 : i64} {
  func.func @_gcn_kernel(%arg0: i32, %arg1: i32, %arg2: memref<256x128xbf16, #tpu.memory_space<vmem>>, %arg3: memref<256x256xbf16, #tpu.memory_space<vmem>>, %arg4: memref<1x128x128xbf16, #tpu.memory_space<vmem>>, %arg5: memref<1x1x128xf32, #tpu.memory_space<vmem>>, %arg6: memref<8x256xf32, #tpu.memory_space<vmem>>, %arg7: memref<8x128xf32, #tpu.memory_space<vmem>>, %arg8: memref<2x256x128xbf16, #tpu.memory_space<vmem>>) attributes {dimension_semantics = [#tpu.dimension_semantics<arbitrary>, #tpu.dimension_semantics<arbitrary>], iteration_bounds = array<i64: 4, 1>, scalar_prefetch = 0 : i64, scratch_operands = 1 : i64, tpu.core_type = #tpu.core_type<tc>, window_params = [{transform_indices = @transform_0, window_bounds = array<i64: 256, 128>}, {pipeline_mode = #tpu.pipeline_mode<synchronous>, transform_indices = @transform_1, window_bounds = array<i64: 256, 256>}, {transform_indices = @transform_2, window_bounds = array<i64: 1, 128, 128>}, {transform_indices = @transform_3, window_bounds = array<i64: 1, 1, 128>}, {pipeline_mode = #tpu.pipeline_mode<synchronous>, transform_indices = @transform_4, window_bounds = array<i64: 8, 256>}, {pipeline_mode = #tpu.pipeline_mode<synchronous>, transform_indices = @transform_5, window_bounds = array<i64: 8, 128>}]} {
    %c256_i32 = arith.constant 256 : i32
    %0 = arith.muli %arg1, %c256_i32 : i32
    %1 = tpu.assume_multiple %0, 256 : i32
    %c0_i32 = arith.constant 0 : i32
    %2 = arith.cmpi eq, %arg0, %c0_i32 : i32
    %3 = arith.extui %2 : i1 to i32
    %c0_i32_0 = arith.constant 0 : i32
    %4 = arith.cmpi ne, %3, %c0_i32_0 : i32
    scf.if %4 {
      %c0 = arith.constant 0 : index
      %c0_3 = arith.constant 0 : index
      %8 = vector.load %arg2[%c0, %c0_3] : memref<256x128xbf16, #tpu.memory_space<vmem>>, vector<256x128xbf16>
      %c0_4 = arith.constant 0 : index
      %9 = arith.index_cast %1 : i32 to index
      %c0_5 = arith.constant 0 : index
      %10 = vector.load %arg8[%c0_4, %9, %c0_5] : memref<2x256x128xbf16, #tpu.memory_space<vmem>>, vector<1x256x128xbf16>
      %11 = vector.shape_cast %10 : vector<1x256x128xbf16> to vector<256x128xbf16>
      %12 = vector.shape_cast %8 : vector<256x128xbf16> to vector<1x256x128xbf16>
      tpu.vector_store %arg8[%c0_4, %9, %c0_5], %12 {strides = array<i32>} : memref<2x256x128xbf16, #tpu.memory_space<vmem>>, vector<1x256x128xbf16>,
    } else {
    }
    %c0_i32_1 = arith.constant 0 : i32
    %5 = arith.cmpi sgt, %arg0, %c0_i32_1 : i32
    %6 = arith.extui %5 : i1 to i32
    %c0_i32_2 = arith.constant 0 : i32
    %7 = arith.cmpi ne, %6, %c0_i32_2 : i32
    scf.if %7 {
      %c2_i32 = arith.constant 2 : i32
      %c0_i32_3 = arith.constant 0 : i32
      %8 = arith.cmpi eq, %c2_i32, %c0_i32_3 : i32
      %c1_i32 = arith.constant 1 : i32
      %9 = arith.select %8, %c1_i32, %c2_i32 : i32
      %10 = arith.remsi %arg0, %9 : i32
      %c0_i32_4 = arith.constant 0 : i32
      %11 = arith.cmpi ne, %10, %c0_i32_4 : i32
      %c0_i32_5 = arith.constant 0 : i32
      %12 = arith.cmpi slt, %10, %c0_i32_5 : i32
      %c0_i32_6 = arith.constant 0 : i32
      %13 = arith.cmpi slt, %9, %c0_i32_6 : i32
      %14 = arith.xori %12, %13 : i1
      %15 = arith.andi %14, %11 : i1
      %16 = arith.addi %10, %9 : i32
      %17 = arith.select %15, %16, %10 : i32
      %c1_i32_7 = arith.constant 1 : i32
      %18 = arith.subi %c1_i32_7, %17 : i32
      %19 = arith.index_cast %18 : i32 to index
      %c0 = arith.constant 0 : index
      %c0_8 = arith.constant 0 : index
      %20 = vector.load %arg8[%19, %c0, %c0_8] : memref<2x256x128xbf16, #tpu.memory_space<vmem>>, vector<1x256x128xbf16>
      %21 = vector.shape_cast %20 : vector<1x256x128xbf16> to vector<256x128xbf16>
      %22 = arith.index_cast %1 : i32 to index
      %c0_9 = arith.constant 0 : index
      %23 = vector.load %arg3[%22, %c0_9] : memref<256x256xbf16, #tpu.memory_space<vmem>>, vector<256x256xbf16>
      %cst = arith.constant dense<0.000000e+00> : vector<256x128xf32>
      %24 = tpu.matmul %23, %21, %cst {dimension_numbers = #tpu.dot_dimension_numbers<[1], [0], [0], [1], [0, 0, 1, 1], [], []>} : vector<256x256xbf16>, vector<256x128xbf16>, vector<256x128xf32> -> vector<256x128xf32>
      %25 = arith.truncf %24 : vector<256x128xf32> to vector<256x128xbf16>
      %c0_10 = arith.constant 0 : index
      %c0_11 = arith.constant 0 : index
      %c0_12 = arith.constant 0 : index
      %26 = vector.load %arg4[%c0_10, %c0_11, %c0_12] : memref<1x128x128xbf16, #tpu.memory_space<vmem>>, vector<1x128x128xbf16>
      %27 = vector.shape_cast %26 : vector<1x128x128xbf16> to vector<128x128xbf16>
      %cst_13 = arith.constant dense<0.000000e+00> : vector<256x128xf32>
      %28 = tpu.matmul %25, %27, %cst_13 {dimension_numbers = #tpu.dot_dimension_numbers<[1], [0], [0], [1], [0, 0, 1, 1], [], []>} : vector<256x128xbf16>, vector<128x128xbf16>, vector<256x128xf32> -> vector<256x128xf32>
      %c0_14 = arith.constant 0 : index
      %c0_15 = arith.constant 0 : index
      %c0_16 = arith.constant 0 : index
      %29 = vector.load %arg5[%c0_14, %c0_15, %c0_16] : memref<1x1x128xf32, #tpu.memory_space<vmem>>, vector<1x1x128xf32>
      %30 = vector.shape_cast %29 : vector<1x1x128xf32> to vector<1x128xf32>
      %31 = vector.broadcast %30 : vector<1x128xf32> to vector<256x128xf32>
      %32 = arith.addf %28, %31 : vector<256x128xf32>
      %cst_17 = arith.constant 0.000000e+00 : f32
      %33 = vector.broadcast %cst_17 : f32 to vector<256x128xf32>
      %34 = arith.maximumf %32, %33 : vector<256x128xf32>
      %35 = arith.truncf %34 : vector<256x128xf32> to vector<256x128xbf16>
      %36 = arith.truncf %32 : vector<256x128xf32> to vector<256x128xbf16>
      %c1_i32_18 = arith.constant 1 : i32
      %37 = arith.cmpi eq, %arg0, %c1_i32_18 : i32
      %38 = arith.extui %37 : i1 to i32
      %c0_i32_19 = arith.constant 0 : i32
      %39 = arith.cmpi ne, %38, %c0_i32_19 : i32
      scf.if %39 {
        %c1 = arith.constant 1 : index
        %46 = arith.index_cast %1 : i32 to index
        %c0_23 = arith.constant 0 : index
        %47 = vector.load %arg8[%c1, %46, %c0_23] : memref<2x256x128xbf16, #tpu.memory_space<vmem>>, vector<1x256x128xbf16>
        %48 = vector.shape_cast %47 : vector<1x256x128xbf16> to vector<256x128xbf16>
        %49 = vector.shape_cast %35 : vector<256x128xbf16> to vector<1x256x128xbf16>
        tpu.vector_store %arg8[%c1, %46, %c0_23], %49 {strides = array<i32>} : memref<2x256x128xbf16, #tpu.memory_space<vmem>>, vector<1x256x128xbf16>,
      } else {
      }
      %c2_i32_20 = arith.constant 2 : i32
      %40 = arith.cmpi eq, %arg0, %c2_i32_20 : i32
      %41 = arith.extui %40 : i1 to i32
      %c0_i32_21 = arith.constant 0 : i32
      %42 = arith.cmpi ne, %41, %c0_i32_21 : i32
      scf.if %42 {
        %c0_23 = arith.constant 0 : index
        %46 = arith.index_cast %1 : i32 to index
        %c0_24 = arith.constant 0 : index
        %47 = vector.load %arg8[%c0_23, %46, %c0_24] : memref<2x256x128xbf16, #tpu.memory_space<vmem>>, vector<1x256x128xbf16>
        %48 = vector.shape_cast %47 : vector<1x256x128xbf16> to vector<256x128xbf16>
        %49 = vector.shape_cast %35 : vector<256x128xbf16> to vector<1x256x128xbf16>
        tpu.vector_store %arg8[%c0_23, %46, %c0_24], %49 {strides = array<i32>} : memref<2x256x128xbf16, #tpu.memory_space<vmem>>, vector<1x256x128xbf16>,
      } else {
      }
      %c3_i32 = arith.constant 3 : i32
      %43 = arith.cmpi eq, %arg0, %c3_i32 : i32
      %44 = arith.extui %43 : i1 to i32
      %c0_i32_22 = arith.constant 0 : i32
      %45 = arith.cmpi ne, %44, %c0_i32_22 : i32
      scf.if %45 {
        %c1 = arith.constant 1 : index
        %46 = arith.index_cast %1 : i32 to index
        %c0_23 = arith.constant 0 : index
        %47 = vector.load %arg8[%c1, %46, %c0_23] : memref<2x256x128xbf16, #tpu.memory_space<vmem>>, vector<1x256x128xbf16>
        %48 = vector.shape_cast %47 : vector<1x256x128xbf16> to vector<256x128xbf16>
        %49 = vector.shape_cast %36 : vector<256x128xbf16> to vector<1x256x128xbf16>
        tpu.vector_store %arg8[%c1, %46, %c0_23], %49 {strides = array<i32>} : memref<2x256x128xbf16, #tpu.memory_space<vmem>>, vector<1x256x128xbf16>,
        %c0_i32_24 = arith.constant 0 : i32
        %50 = arith.cmpi eq, %arg1, %c0_i32_24 : i32
        %51 = arith.extui %50 : i1 to i32
        %c0_i32_25 = arith.constant 0 : i32
        %52 = arith.cmpi ne, %51, %c0_i32_25 : i32
        scf.if %52 {
          %c1_26 = arith.constant 1 : index
          %c0_27 = arith.constant 0 : index
          %c0_28 = arith.constant 0 : index
          %53 = vector.load %arg8[%c1_26, %c0_27, %c0_28] : memref<2x256x128xbf16, #tpu.memory_space<vmem>>, vector<1x256x128xbf16>
          %54 = vector.shape_cast %53 : vector<1x256x128xbf16> to vector<256x128xbf16>
          %55 = arith.extf %54 : vector<256x128xbf16> to vector<256x128xf32>
          %c0_29 = arith.constant 0 : index
          %c0_30 = arith.constant 0 : index
          %56 = vector.load %arg6[%c0_29, %c0_30] : memref<8x256xf32, #tpu.memory_space<vmem>>, vector<8x256xf32>
          %cst_31 = arith.constant dense<0.000000e+00> : vector<8x128xf32>
          %57 = tpu.matmul %56, %55, %cst_31 {dimension_numbers = #tpu.dot_dimension_numbers<[1], [0], [0], [1], [0, 0, 1, 1], [], []>} : vector<8x256xf32>, vector<256x128xf32>, vector<8x128xf32> -> vector<8x128xf32>
          %58 = arith.mulf %57, %57 : vector<8x128xf32>
          %cst_32 = arith.constant dense<0.000000e+00> : vector<8xf32>
          %59 = vector.multi_reduction <add>, %58, %cst_32 [1] : vector<8x128xf32> to vector<8xf32>
          %60 = vector.shape_cast %59 : vector<8xf32> to vector<8x1xf32>
          %cst_33 = arith.constant 1.000000e-24 : f32
          %61 = vector.broadcast %cst_33 : f32 to vector<8x1xf32>
          %62 = arith.maximumf %60, %61 : vector<8x1xf32>
          %63 = math.rsqrt %62 : vector<8x1xf32>
          %64 = vector.broadcast %63 : vector<8x1xf32> to vector<8x128xf32>
          %65 = arith.mulf %57, %64 : vector<8x128xf32>
          %c0_34 = arith.constant 0 : index
          %c0_35 = arith.constant 0 : index
          %66 = vector.load %arg7[%c0_34, %c0_35] : memref<8x128xf32, #tpu.memory_space<vmem>>, vector<8x128xf32>
          tpu.vector_store %arg7[%c0_34, %c0_35], %65 {strides = array<i32>} : memref<8x128xf32, #tpu.memory_space<vmem>>, vector<8x128xf32>,
        } else {
        }
      } else {
      }
    } else {
    }
    return
  }
  func.func @transform_0(%arg0: i32, %arg1: i32) -> (i32, i32) {
    %c0_i32 = arith.constant 0 : i32
    %0 = arith.cmpi eq, %arg0, %c0_i32 : i32
    %c0_i32_0 = arith.constant 0 : i32
    %1 = arith.select %0, %arg1, %c0_i32_0 : i32
    %c0_i32_1 = arith.constant 0 : i32
    %c0_i32_2 = arith.constant 0 : i32
    return %1, %c0_i32_1 : i32, i32
  }
  func.func @transform_1(%arg0: i32, %arg1: i32) -> (i32, i32) {
    %c0_i32 = arith.constant 0 : i32
    %c0_i32_0 = arith.constant 0 : i32
    %c0_i32_1 = arith.constant 0 : i32
    return %c0_i32, %c0_i32_0 : i32, i32
  }
  func.func @transform_2(%arg0: i32, %arg1: i32) -> (i32, i32, i32) {
    %c1_i32 = arith.constant 1 : i32
    %0 = arith.subi %arg0, %c1_i32 : i32
    %c0_i32 = arith.constant 0 : i32
    %1 = arith.maxsi %0, %c0_i32 : i32
    %c0_i32_0 = arith.constant 0 : i32
    %c0_i32_1 = arith.constant 0 : i32
    %c0_i32_2 = arith.constant 0 : i32
    return %1, %c0_i32_0, %c0_i32_1 : i32, i32, i32
  }
  func.func @transform_3(%arg0: i32, %arg1: i32) -> (i32, i32, i32) {
    %c1_i32 = arith.constant 1 : i32
    %0 = arith.subi %arg0, %c1_i32 : i32
    %c0_i32 = arith.constant 0 : i32
    %1 = arith.maxsi %0, %c0_i32 : i32
    %c0_i32_0 = arith.constant 0 : i32
    %c0_i32_1 = arith.constant 0 : i32
    %c0_i32_2 = arith.constant 0 : i32
    return %1, %c0_i32_0, %c0_i32_1 : i32, i32, i32
  }
  func.func @transform_4(%arg0: i32, %arg1: i32) -> (i32, i32) {
    %c0_i32 = arith.constant 0 : i32
    %c0_i32_0 = arith.constant 0 : i32
    %c0_i32_1 = arith.constant 0 : i32
    return %c0_i32, %c0_i32_0 : i32, i32
  }
  func.func @transform_5(%arg0: i32, %arg1: i32) -> (i32, i32) {
    %c0_i32 = arith.constant 0 : i32
    %c0_i32_0 = arith.constant 0 : i32
    %c0_i32_1 = arith.constant 0 : i32
    return %c0_i32, %c0_i32_0 : i32, i32
  }
}

</mosaic_0001>

<bundles_post_ra>
// kernel: tpu_custom_call.1
= control target key start
LH: loop header
LB: loop body
LE: loop exit
PB: predicated region body
PF: predicated region fallthrough
CT: control target
= control target key end

     0   :  { %10 = vsyncpa [#allocation4], 0  ;;  %s2860_s0 = inlined_call_operand.hbm [shape: bf16[256,128], index: 0, kind: input, shape index: {}]   ;;  %s2861_s1 = inlined_call_operand.hbm [shape: bf16[256,256], index: 1, kind: input, shape index: {}]   ;;  %s2862_s2 = inlined_call_operand.hbm [shape: bf16[3,128,128], index: 2, kind: input, shape index: {}]   ;;  %s2863_s3 = inlined_call_operand.vmem [shape: f32[3,1,128], index: 3, kind: input, shape index: {}]   ;;  %s2864_s4 = inlined_call_operand.hbm [shape: f32[8,256], index: 4, kind: input, shape index: {}]   ;;  %s2865_s5 = inlined_call_operand.hbm [shape: f32[8,128], index: 5, kind: output, shape index: {}]  }
   0x1   :  { %12 = vsyncpa [#allocation4 + $0x1], 0 }
   0x2   :  { %13 = vsyncpa [#allocation7], 0 }
   0x3   :  { %14 = vsyncpa [#allocation5], 0  ;;  %s2374_s18 = smov 0   ;;  %s2376_s19 = smov 0  }
   0x4   :  { %s2378_s20 = smov 0   ;;  %s2380_s21 = smov 0  }
   0x5   :  { %s2382_s22 = smov 0   ;;  %s2384_s23 = smov 0  }
   0x6 LB: > { %s2403_s24 = sadd.s32 4294967295, %s2333_s23   ;;  %p109_p1 = scmp.ne.s32.totalorder %s2317_s19, %s2313_s18  ;;  %s2333_s23 = sphi %s2384_s23, %s20_s23   ;;  %s2329_s22 = sphi %s2382_s22, %s2902_s22   ;;  %s2325_s21 = sphi %s2380_s21, %s2901_s21   ;;  %s2321_s20 = sphi %s2378_s20, %s2900_s20   ;;  %s2317_s19 = sphi %s2376_s19, %s2899_s19   ;;  %s2313_s18 = sphi %s2374_s18, %s2898_s18  }
   0x7   : > { %p2866_p2 = scmp.eq.s32.totalorder %s2403_s24, 0  ;;  %p1562_p3 = scmp.ge.s32.totalorder %s2333_s23, 1 }
   0x8   : > { %p194_p4 = scmp.lt.s32.totalorder %s2333_s23, 5  ;;  %s2335_s27 = smov [#allocation6]  }
   0x9   : > { %p2413_p5 = por %p2866_p2, %p109_p1  ;;  %s206_s28 = sshll.u32 %s2335_s27, 4  ;;  %s207_s28 = int_to_ptr.vmem [resolvable:$true] %s206_s28 }
   0xa   : > { %p2417_p6 = pnand %p1562_p3, %p194_p4  ;;  %s231_s30 = sand.u32 1, %s2333_s23  }
   0xb   : > { %s2874_s25 = scalar_select %p2413_p5, 1, 0 }
   0xc   : > { %s2875_s26 = scalar_select %p2417_p6, 1, 0 }
   0xd   : > { %p1974_p7 = pneg %p2417_p6  ;;  %s2127_s8 = scalar_lea.hbm %s2861_s1, 4096 }
   0xe   : > { %p2128_p11 = scmp.ne.s32.totalorder %s2861_s1, %s2127_s8  ;;  %p2134_p3 = scmp.lt.u32.totalorder %s2127_s8, %s2861_s1 }
   0xf   : > { %p2425_p8 = pnand %p1974_p7, %p2866_p2 }
  0x11   : > { %s2876_s29 = scalar_select %p2425_p8, 1, 0 }
  0x12   : > { %p2869_p12 = pneg %p2425_p8 }
  0x14   : > { %p2130_p13 = pnand %p2869_p12, %p2128_p11 }
  0x16   : > { %p2131_p1 = pneg %p2130_p13 }
  0x18   : > { %p2136_p4 = pnand %p2134_p3, %p2131_p1 }
  0x1a   : > { %2139 = shalt.err (!%p2136_p4)
}
  0x1b   : > { %s2140_s13 = scalar_lea.vmem %s207_s28, 4096  ;;  %p2148_p9 = scmp.lt.s32.totalorder %s207_s28, %s207_s28 }
  0x1c   : > { %p2141_p7 = scmp.ne.s32.totalorder %s207_s28, %s2140_s13  ;;  %p2149_p0 = scmp.lt.s32.totalorder %s2140_s13, %s2140_s13 }
  0x1e   : > { %p2143_p2 = pnand %p2141_p7, %p2869_p12  ;;  %p2150_p5 = por %p2149_p0, %p2148_p9 }
  0x20   : > { %p2144_p10 = pneg %p2143_p2 }
  0x22   : > { %p2151_p6 = pnand %p2150_p5, %p2144_p10 }
  0x24   : > { %2154 = shalt.err (!%p2151_p6)
}
  0x25   : > { %s2336_s14 = smov 128   ;;  %s2337_s15 = smov 8  }
  0x26   : > { %1977 = dma.hbm_to_vmem [thread:$0]  (!%p2425_p8), %s2861_s1, 4096, %s207_s28, [#allocation7], %s2336_s14, %s2336_s14, %s2337_s15  }
  0x27   : > { %p2877_p2 = scmp.ne.s32.totalorder %s2321_s20, %s2317_s19  ;;  %p2878_p11 = scmp.eq.s32.totalorder %s2333_s23, 0 }
  0x28   : > { %p2880_p5 = scmp.lt.s32.totalorder %s2333_s23, 4  ;;  %s2338_s27 = smov [#allocation3]  }
  0x29   : > { %p105_p13 = por %p2878_p11, %p2877_p2  ;;  %p2879_p0 = pmov %p2878_p11 }
  0x2a   : > { %s244_s6 = sshll.u32 %s2338_s27, 4  ;;  %p2882_p9 = pmov %p2880_p5  ;;  %s245_s6 = int_to_ptr.vmem [resolvable:$true] %s244_s6 }
  0x2b   : > { %p2463_p6 = pnand %p2880_p5, %p2879_p0  ;;  %s2473_s8 = scalar_lea.sflag [#allocation4], %s231_s30 }
  0x2c   : > { %p2469_p10 = pnand %p2882_p9, %p105_p13  ;;  %s2155_s10 = scalar_lea.hbm %s2860_s0, 2048 }
  0x2d   : > { %p2156_p1 = scmp.ne.s32.totalorder %s2860_s0, %s2155_s10  ;;  %p2157_p3 = pneg %p2463_p6 }
  0x2e   : > { %s2883_s7 = scalar_select %p2469_p10, 1, 0 }
  0x2f   : > { %p2158_p4 = pnand %p2157_p3, %p2156_p1  ;;  %p2162_p2 = scmp.lt.u32.totalorder %s2155_s10, %s2860_s0 }
  0x31   : > { %p2159_p7 = pneg %p2158_p4 }
  0x33   : > { %p2164_p11 = pnand %p2162_p2, %p2159_p7 }
  0x35   : > { %2167 = shalt.err (!%p2164_p11)
}
  0x36   : > { %s2168_s30 = scalar_lea.vmem %s245_s6, 2048  ;;  %s2175_s15 = scalar_lea.vmem %s245_s6, 4096 }
  0x37   : > { %p2169_p13 = scmp.ne.s32.totalorder %s245_s6, %s2168_s30  ;;  %p2176_p9 = scmp.lt.s32.totalorder %s245_s6, %s245_s6 }
  0x38   : > { %p2177_p12 = scmp.lt.s32.totalorder %s2175_s15, %s2168_s30 }
  0x39   : > { %p2171_p0 = pnand %p2169_p13, %p2157_p3 }
  0x3a   : > { %p2178_p10 = por %p2177_p12, %p2176_p9 }
  0x3b   : > { %p2172_p5 = pneg %p2171_p0 }
  0x3d   : > { %p2179_p8 = pnand %p2178_p10, %p2172_p5 }
  0x3f   : > { %2182 = shalt.err (!%p2179_p8)
}
  0x40   : > { %s2873_s16 = smov 64   ;;  %s2340_s17 = smov 4  }
  0x41   : > { %1984 = dma.hbm_to_vmem [thread:$0]  (!%p2463_p6), %s2860_s0, 2048, %s245_s6, %s2473_s8, %s2873_s16, %s2873_s16, %s2340_s17  }
  0x42   : > { %s2341_s9 = smov [#allocation9]   ;;  %s2183_s13 = scalar_lea.hbm %s2864_s4, 256 }
  0x43   : > { %s220_s10 = sshll.u32 %s2341_s9, 4  ;;  %p2184_p8 = scmp.ne.s32.totalorder %s2864_s4, %s2183_s13  ;;  %s221_s10 = int_to_ptr.vmem [resolvable:$true] %s220_s10 }
  0x44   : > { %p2884_p12 = scmp.ne.s32.totalorder %s2876_s29, 0  ;;  %p2190_p4 = scmp.lt.u32.totalorder %s2183_s13, %s2864_s4 }
  0x46   : > { %p2885_p10 = pneg %p2884_p12 }
  0x48   : > { %p2186_p1 = pnand %p2184_p8, %p2885_p10 }
  0x4a   : > { %p2187_p3 = pneg %p2186_p1 }
  0x4c   : > { %p2192_p6 = pnand %p2190_p4, %p2187_p3 }
  0x4e   : > { %2195 = shalt.err (!%p2192_p6)
}
  0x4f   : > { %s2196_s6 = scalar_lea.vmem %s221_s10, 256  ;;  %p2886_p2 = pmov %p2885_p10 }
  0x50   : > { %p2197_p7 = scmp.ne.s32.totalorder %s221_s10, %s2196_s6  ;;  %p2204_p0 = scmp.lt.s32.totalorder %s221_s10, %s221_s10 }
  0x51   : > { %p2205_p5 = scmp.lt.s32.totalorder %s2196_s6, %s2196_s6 }
  0x52   : > { %p2199_p11 = pnand %p2197_p7, %p2886_p2 }
  0x53   : > { %p2206_p9 = por %p2205_p5, %p2204_p0 }
  0x54   : > { %p2200_p13 = pneg %p2199_p11 }
  0x56   : > { %p2207_p8 = pnand %p2206_p9, %p2200_p13 }
  0x58   : > { %2210 = shalt.err (!%p2207_p8)
}
  0x59   : > { %1980 = dma.hbm_to_vmem [thread:$0]  (!%p2884_p12), %s2864_s4, 256, %s221_s10, [#allocation7]  }
  0x5a   : > { %s32_s9 = sadd.s32 1, %s2329_s22  ;;  %s1558_s11 = sadd.s32 4294967295, %s2329_s22 }
  0x5b   : > { %p34_p10 = scmp.ge.s32.totalorder %s32_s9, 4  ;;  %p88_p1 = scmp.gt.s32.totalorder %s1558_s11, 0 }
  0x5c   : > { %s256_s12 = sand.u32 1, %s2321_s20   ;;  %s96_s28 = sadd.s32 1, %s2321_s20 }
  0x5d   : > { %s2904_s9 = smov (%p34_p10, %s32_s9), 0  ;;  %s2906_s11 = smov (!%p88_p1, %s1558_s11), 0 }
  0x5e   : > { %s1559_s29 = sadd.s32 4294967295, %s2904_s9  ;;  %s1567_s13 = sshll.u32 %s256_s12, 6 }
  0x5f   : > { %p91_p3 = scmp.gt.s32.totalorder %s1559_s29, 0  ;;  %s1685_s14 = sshll.u32 %s2906_s11, 10 }
  0x60   : > { %s258_s30 = scalar_lea.vmem [#allocation8], %s1567_s13  ;;  %s2524_s6 = scalar_lea.hbm %s2862_s2, %s1685_s14 }
  0x61   : > { %s268_s18 = sshll.u32 %s258_s30, 4  ;;  %s2908_s29 = smov (!%p91_p3, %s1559_s29), 0  ;;  %s2526_s18 = int_to_ptr.vmem [resolvable:$true] %s268_s18 }
  0x62   : > { %s93_s27 = ssub.s32 %s2906_s11, %s2908_s29  ;;  %s2211_s13 = scalar_lea.hbm %s2524_s6, 1024 }
  0x63   : > { %p2529_p12 = scmp.eq.s32.totalorder %s93_s27, 0  ;;  %p2212_p4 = scmp.ne.s32.totalorder %s2524_s6, %s2211_s13 }
  0x64   : > { %p2888_p6 = scmp.ne.s32.totalorder %s2883_s7, 0  ;;  %s2216_s10 = scalar_lea.hbm %s2862_s2, 3072 }
  0x65   : > { %p2217_p13 = scmp.lt.u32.totalorder %s2524_s6, %s2862_s2  ;;  %p2218_p0 = scmp.lt.u32.totalorder %s2216_s10, %s2211_s13 }
  0x66   : > { %p2213_p7 = pneg %p2888_p6  ;;  %p2220_p9 = scmp.lt.u32.totalorder %s2211_s13, %s2524_s6 }
  0x67   : > { %p2219_p5 = por %p2218_p0, %p2217_p13 }
  0x68   : > { %p2214_p2 = pnand %p2213_p7, %p2212_p4 }
  0x69   : > { %p2221_p8 = por %p2220_p9, %p2219_p5 }
  0x6a   : > { %p2215_p11 = pneg %p2214_p2 }
  0x6c   : > { %p2222_p10 = pnand %p2221_p8, %p2215_p11 }
  0x6e   : > { %2225 = shalt.err (!%p2222_p10)
}
  0x6f   : > { %s2226_s11 = scalar_lea.vmem %s2526_s18, 1024  ;;  %s2342_s29 = smov [#allocation8]  }
  0x70   : > { %p2227_p1 = scmp.ne.s32.totalorder %s2526_s18, %s2226_s11  ;;  %s2231_s27 = sshll.u32 %s2342_s29, 4  ;;  %s2232_s27 = int_to_ptr.vmem [resolvable:$false] %s2231_s27 }
  0x71   : > { %s2233_s16 = scalar_lea.vmem %s2232_s27, 2048  ;;  %p2234_p2 = scmp.lt.s32.totalorder %s2526_s18, %s2232_s27 }
  0x72   : > { %p2229_p3 = pnand %p2227_p1, %p2213_p7  ;;  %p2235_p13 = scmp.lt.s32.totalorder %s2233_s16, %s2226_s11 }
  0x74   : > { %p2230_p4 = pneg %p2229_p3  ;;  %p2236_p0 = por %p2235_p13, %p2234_p2 }
  0x76   : > { %p2237_p5 = pnand %p2236_p0, %p2230_p4 }
  0x78   : > { %2240 = shalt.err (!%p2237_p5)
}
  0x79   : > { %s2889_s13 = smov 64   ;;  %p2890_p7 = scmp.ne.s32.totalorder %s2875_s26, 0 }
  0x7a   : > { %1987 = dma.hbm_to_vmem [thread:$0]  (!%p2888_p6), %s2524_s6, 1024, %s2526_s18, %s2473_s8, %s2889_s13, %s2889_s13, %s2340_s17  }
  0x7b   : > { %s2567_s14 = scalar_select %p2529_p12, %s2321_s20, %s96_s28  }
  0x7c   : > { %292 = sbr.rel (%p2890_p7) target bundleno = 1189 (0x4a5), region = 40  ;;  %s294_s7 = sand.u32 (!%p2890_p7), 1, %s2403_s24  }
  0x7d   : > { %s295_s30 = scalar_lea.sflag (!%p2890_p7), [#allocation4], %s294_s7  ;;  %p2891_p11 = scmp.eq.s32.totalorder (!%p2890_p7), %s2403_s24, 0 }
  0x83   : > { %2292 = dma.done.wait (%p2891_p11), %s295_s30, 2048   ;;  %p2892_p9 = pmov %p2891_p11 }
  0x85   : > { %2294 = vsyncadd (%p2892_p9), %s295_s30, 4294965248  ;;  %p2893_p8 = pmov %p2892_p9 }
  0x87   : > { %2296 = dma.done.wait (%p2893_p8), [#allocation7], 4096   ;;  %p2894_p6 = pmov %p2893_p8 }
  0x88   : > { %s309_s8 = sand.u32 1, %s2317_s19   ;;  %p2895_p12 = scmp.ne.s32.totalorder %s2874_s25, 0 }
  0x89   : > { %2298 = vsyncadd (%p2894_p6), [#allocation7], 4294963200  ;;  %s1574_s26 = sshll.u32 %s309_s8, 6 }
  0x8a   : > { %s2581_s17 = scalar_lea.vmem [#allocation8], %s1574_s26 }
  0x8b   : > { %2300 = dma.done.wait (%p2895_p12), %s295_s30, 1024  }
  0x8c   : > { %2302 = vsyncadd (%p2895_p12), %s295_s30, 4294966272  ;;  %p2896_p10 = pmov %p2894_p6 }
  0x8d   : > { %p2897_p1 = pmov %p2894_p6 }
  0x8e   : > { %2304 = dma.done.wait (%p2896_p10), [#allocation7], 256  }
  0x8f   : > { %2306 = vsyncadd (%p2897_p1), [#allocation7], 4294967040  ;;  %s1576_s18 = sadd.s32 4294967295, %s2325_s21  ;;  %p1582_p2 = scmp.ne.s32.totalorder %s2325_s21, 0 }
  0x90   : > { %p355_p3 = scmp.gt.s32.totalorder %s1576_s18, 0  ;;  %p1577_p4 = scmp.lt.s32.totalorder %s1576_s18, 2  ;;  %v2053_v0 = vld [vmem:[#allocation3] sm:$0xff] (!%p1582_p2)   ;;  %v2054_v1 = vld [vmem:[#allocation3 + $0x8] sm:$0xff] (!%p1582_p2)   ;;  %v2055_v2 = vld [vmem:[#allocation3 + $0x10] sm:$0xff] (!%p1582_p2)  }
  0x91   : > { %368 = sbr.rel (%p1582_p2) target bundleno = 153 (0x99), region = 60  ;;  %501 = vst [vmem:[#allocation2] sm:$0xff] (!%p1582_p2), %v2053_v0  ;;  %502 = vst [vmem:[#allocation2 + $0x8] sm:$0xff] (!%p1582_p2), %v2054_v1  ;;  %v2056_v3 = vld [vmem:[#allocation3 + $0x18] sm:$0xff] (!%p1582_p2)   ;;  %v2057_v4 = vld [vmem:[#allocation3 + $0x20] sm:$0xff] (!%p1582_p2)  }
  0x92   : > { %s2910_s18 = smov (!%p355_p3, %s1576_s18), 0  ;;  %503 = vst [vmem:[#allocation2 + $0x10] sm:$0xff] (!%p1582_p2), %v2055_v2  ;;  %504 = vst [vmem:[#allocation2 + $0x18] sm:$0xff] (!%p1582_p2), %v2056_v3  ;;  %v2058_v5 = vld [vmem:[#allocation3 + $0x28] sm:$0xff] (!%p1582_p2)   ;;  %v2059_v6 = vld [vmem:[#allocation3 + $0x30] sm:$0xff] (!%p1582_p2)  }
  0x93   : > { %s2912_s18 = smov (!%p1577_p4, %s2910_s18), 2  ;;  %505 = vst [vmem:[#allocation2 + $0x20] sm:$0xff] (!%p1582_p2), %v2057_v4  ;;  %506 = vst [vmem:[#allocation2 + $0x28] sm:$0xff] (!%p1582_p2), %v2058_v5  ;;  %v2060_v7 = vld [vmem:[#allocation3 + $0x38] sm:$0xff] (!%p1582_p2)   ;;  %v2061_v8 = vld [vmem:[#allocation3 + $0x40] sm:$0xff] (!%p1582_p2)  }
  0x94   : > { %s359_s12 = scalar_lea.vmem %s2863_s3, %s2912_s18  ;;  %507 = vst [vmem:[#allocation2 + $0x30] sm:$0xff] (!%p1582_p2), %v2059_v6  ;;  %508 = vst [vmem:[#allocation2 + $0x38] sm:$0xff] (!%p1582_p2), %v2060_v7  ;;  %v2062_v9 = vld [vmem:[#allocation3 + $0x48] sm:$0xff] (!%p1582_p2)   ;;  %v2063_v10 = vld [vmem:[#allocation3 + $0x50] sm:$0xff] (!%p1582_p2)  }
  0x95   : > { %509 = vst [vmem:[#allocation2 + $0x40] sm:$0xff] (!%p1582_p2), %v2061_v8  ;;  %510 = vst [vmem:[#allocation2 + $0x48] sm:$0xff] (!%p1582_p2), %v2062_v9  ;;  %v2064_v11 = vld [vmem:[#allocation3 + $0x58] sm:$0xff] (!%p1582_p2)   ;;  %v2065_v12 = vld [vmem:[#allocation3 + $0x60] sm:$0xff] (!%p1582_p2)  }
  0x96   : > { %511 = vst [vmem:[#allocation2 + $0x50] sm:$0xff] (!%p1582_p2), %v2063_v10  ;;  %512 = vst [vmem:[#allocation2 + $0x58] sm:$0xff] (!%p1582_p2), %v2064_v11  ;;  %v2066_v13 = vld [vmem:[#allocation3 + $0x68] sm:$0xff] (!%p1582_p2)   ;;  %v2067_v14 = vld [vmem:[#allocation3 + $0x70] sm:$0xff] (!%p1582_p2)  }
  0x97   : > { %513 = vst [vmem:[#allocation2 + $0x60] sm:$0xff] (!%p1582_p2), %v2065_v12  ;;  %514 = vst [vmem:[#allocation2 + $0x68] sm:$0xff] (!%p1582_p2), %v2066_v13  ;;  %v2068_v15 = vld [vmem:[#allocation3 + $0x78] sm:$0xff] (!%p1582_p2)  }
  0x98   : > { %515 = vst [vmem:[#allocation2 + $0x70] sm:$0xff] %v2067_v14  ;;  %516 = vst [vmem:[#allocation2 + $0x78] sm:$0xff] %v2068_v15 }
  0x99 PF: > { %p1599_p13 = scmp.le.s32.totalorder %s2325_s21, 0 }
  0x9a   : > { %p521_p0 = scmp.lt.s32.totalorder (!%p1599_p13), %s2325_s21, 0  ;;  %s522_s25 = ssub.s32 (!%p1599_p13), 0, %s2325_s21  ;;  %v2071_v16 = vld [vmem:[#allocation6 + $0x4] ss:$8 sps:$4 sm:$0xff] (!%p1599_p13)   ;;  %v2069_v35 = vld [vmem:[#allocation6] ss:$8 sps:$4 sm:$0xff] (!%p1599_p13)  }
  0x9b   : > { %520 = sbr.rel (%p1599_p13) target bundleno = 1164 (0x48c), region = 64  ;;  %s1600_s10 = smin.u32 (!%p1599_p13), %s2325_s21, %s522_s25  ;;  %782 = vmatprep.mubr.bf16.mxu0 (!%p1599_p13), %v2071_v16  ;;  %v2101_v23 = vld [vmem:[#allocation6 + $0xc4] ss:$8 sps:$4 sm:$0xff] (!%p1599_p13)   ;;  %v2099_v36 = vld [vmem:[#allocation6 + $0xc0] ss:$8 sps:$4 sm:$0xff] (!%p1599_p13)   ;;  %v2119_v40 = vld [vmem:[%s2581_s17 + $0x10] sm:$0xff] (!%p1599_p13)  }
  0x9c   : > { %s524_s15 = sand.u32 (!%p1599_p13), 1, %s1600_s10   ;;  %878 = vmatprep.mubr.bf16.mxu1 (!%p1599_p13), %v2101_v23  ;;  %v2117_v34 = vld [vmem:[%s2581_s17] sm:$0xff] (!%p1599_p13)   ;;  %v2072_v37 = vld [vmem:[#allocation6 + $0x14] ss:$8 sps:$4 sm:$0xff] (!%p1599_p13)   ;;  %v2118_v39 = vld [vmem:[%s2581_s17 + $0x8] sm:$0xff] (!%p1599_p13)   ;;  %p1646_p7 = scmp.ne.s32.totalorder (!%p1599_p13), %s2325_s21, 1 }
  0x9d   : > { %s525_s11 = ssub.s32 (!%p1599_p13), 0, %s524_s15  ;;  %v2105_v38 = vld [vmem:[#allocation6 + $0xd4] ss:$8 sps:$4 sm:$0xff] (!%p1599_p13)   ;;  %v2074_v41 = vld [vmem:[#allocation6 + $0x10] ss:$8 sps:$4 sm:$0xff] (!%p1599_p13)   ;;  %v2121_v3 = vld [vmem:[%s2581_s17 + $0x20] sm:$0xff] (!%p1599_p13)  }
  0x9e   : > { %v2107_v42 = vld [vmem:[#allocation6 + $0xd0] ss:$8 sps:$4 sm:$0xff] (!%p1599_p13)   ;;  %v2075_v43 = vld [vmem:[#allocation6 + $0x24] ss:$8 sps:$4 sm:$0xff] (!%p1599_p13)   ;;  %v2077_v46 = vld [vmem:[#allocation6 + $0x20] ss:$8 sps:$4 sm:$0xff] (!%p1599_p13)  }
  0x9f   : > { %v2111_v44 = vld [vmem:[#allocation6 + $0xe4] ss:$8 sps:$4 sm:$0xff] (!%p1599_p13)   ;;  %v2120_v45 = vld [vmem:[%s2581_s17 + $0x18] sm:$0xff] (!%p1599_p13)   ;;  %v2113_v47 = vld [vmem:[#allocation6 + $0xe0] ss:$8 sps:$4 sm:$0xff] (!%p1599_p13)  }
  0xa0   : > { %v2078_v48 = vld [vmem:[#allocation6 + $0x34] ss:$8 sps:$4 sm:$0xff] (!%p1599_p13)   ;;  %v2080_v50 = vld [vmem:[#allocation6 + $0x30] ss:$8 sps:$4 sm:$0xff] (!%p1599_p13)   ;;  %v2081_v52 = vld [vmem:[#allocation6 + $0x44] ss:$8 sps:$4 sm:$0xff] (!%p1599_p13)  }
  0xa1   : > { %v2114_v49 = vld [vmem:[#allocation6 + $0xf4] ss:$8 sps:$4 sm:$0xff] (!%p1599_p13)   ;;  %v2116_v51 = vld [vmem:[#allocation6 + $0xf0] ss:$8 sps:$4 sm:$0xff] (!%p1599_p13)   ;;  %v2083_v53 = vld [vmem:[#allocation6 + $0x40] ss:$8 sps:$4 sm:$0xff] (!%p1599_p13)  }
  0xa2   : > { %s2914_s11 = smov (!%p521_p0, %s525_s11), %s524_s15  ;;  %v2084_v54 = vld [vmem:[#allocation6 + $0x54] ss:$8 sps:$4 sm:$0xff]   ;;  %v2086_v55 = vld [vmem:[#allocation6 + $0x50] ss:$8 sps:$4 sm:$0xff]   ;;  %v2087_v56 = vld [vmem:[#allocation6 + $0x64] ss:$8 sps:$4 sm:$0xff]  }
  0xa3   : > { %p1602_p5 = scmp.lt.s32.totalorder %s2914_s11, 0  ;;  %s531_s29 = sadd.s32 2, %s2914_s11  ;;  %v2089_v57 = vld [vmem:[#allocation6 + $0x60] ss:$8 sps:$4 sm:$0xff]   ;;  %v2090_v58 = vld [vmem:[#allocation6 + $0x74] ss:$8 sps:$4 sm:$0xff]  }
  0xa4   : > { %v2092_v59 = vld [vmem:[#allocation6 + $0x70] ss:$8 sps:$4 sm:$0xff]   ;;  %v2093_v60 = vld [vmem:[#allocation6 + $0x84] ss:$8 sps:$4 sm:$0xff]   ;;  %v2095_v61 = vld [vmem:[#allocation6 + $0x80] ss:$8 sps:$4 sm:$0xff]  }
  0xa5   : > { %s2916_s29 = smov (!%p1602_p5, %s531_s29), %s2914_s11  ;;  %v2096_v62 = vld [vmem:[#allocation6 + $0x94] ss:$8 sps:$4 sm:$0xff]   ;;  %v2098_v63 = vld [vmem:[#allocation6 + $0x90] ss:$8 sps:$4 sm:$0xff]   ;;  %v2102_v0 = vld [vmem:[#allocation6 + $0xa4] ss:$8 sps:$4 sm:$0xff]  }
  0xa6   : > { %s533_s27 = ssub.s32 1, %s2916_s29  ;;  %v2104_v1 = vld [vmem:[#allocation6 + $0xa0] ss:$8 sps:$4 sm:$0xff]   ;;  %v2108_v2 = vld [vmem:[#allocation6 + $0xb4] ss:$8 sps:$4 sm:$0xff]  }
  0xa7   : > { %s1688_s16 = sshll.u32 %s533_s27, 7  ;;  %v2110_v4 = vld [vmem:[#allocation6 + $0xb0] ss:$8 sps:$4 sm:$0xff]   ;;  %v2122_v5 = vld [vmem:[%s2581_s17 + $0x28] sm:$0xff]  }
  0xa8   : > { %s2603_s13 = scalar_lea.vmem [#allocation2], %s1688_s16  ;;  %v2123_v6 = vld [vmem:[%s2581_s17 + $0x30] sm:$0xff]   ;;  %v2124_v7 = vld [vmem:[%s2581_s17 + $0x38] sm:$0xff]  }
  0xa9   : > { %v545_v17 = vld [vmem:[%s2603_s13 + $0x40] sm:$0xff]  ;;  %v546_v19 = vld [vmem:[%s2603_s13 + $0x48] sm:$0xff]  ;;  %v547_v21 = vld [vmem:[%s2603_s13 + $0x50] sm:$0xff] }
  0xaa   : > { %v537_v18 = vld [vmem:[%s2603_s13] sm:$0xff]  ;;  %1689 = vmatprep.subr.bf16.mxu0 %v545_v17  ;;  %1940 = vmatprep.subr.bf16.mxu1 %v545_v17  ;;  %v538_v20 = vld [vmem:[%s2603_s13 + $0x8] sm:$0xff]  ;;  %v539_v22 = vld [vmem:[%s2603_s13 + $0x10] sm:$0xff] }
  0xab   : > { %1690 = vmatpush3.bf16.msra.mxu0 %v537_v18  ;;  %1948 = vmatpush3.bf16.msra.mxu1 %v537_v18  ;;  %v548_v24 = vld [vmem:[%s2603_s13 + $0x58] sm:$0xff]  ;;  %v549_v26 = vld [vmem:[%s2603_s13 + $0x60] sm:$0xff]  ;;  %v550_v28 = vld [vmem:[%s2603_s13 + $0x68] sm:$0xff] }
  0xac   : > { %1691 = vmatprep.subr.bf16.mxu0 %v546_v19  ;;  %1941 = vmatprep.subr.bf16.mxu1 %v546_v19  ;;  %v540_v25 = vld [vmem:[%s2603_s13 + $0x18] sm:$0xff]  ;;  %v541_v27 = vld [vmem:[%s2603_s13 + $0x20] sm:$0xff]  ;;  %v542_v29 = vld [vmem:[%s2603_s13 + $0x28] sm:$0xff] }
  0xad   : > { %v551_v30 = vld [vmem:[%s2603_s13 + $0x70] sm:$0xff]  ;;  %v552_v32 = vld [vmem:[%s2603_s13 + $0x78] sm:$0xff] }
  0xae   : > { %v543_v31 = vld [vmem:[%s2603_s13 + $0x30] sm:$0xff]  ;;  %v544_v33 = vld [vmem:[%s2603_s13 + $0x38] sm:$0xff] }
  0xaf   : > { %1692 = vmatpush3.bf16.msra.mxu0 %v538_v20  ;;  %1949 = vmatpush3.bf16.msra.mxu1 %v538_v20 }
  0xb0   : > { %1693 = vmatprep.subr.bf16.mxu0 %v547_v21  ;;  %1942 = vmatprep.subr.bf16.mxu1 %v547_v21 }
  0xb3   : > { %1694 = vmatpush3.bf16.msra.mxu0 %v539_v22  ;;  %1950 = vmatpush3.bf16.msra.mxu1 %v539_v22 }
  0xb4   : > { %1695 = vmatprep.subr.bf16.mxu0 %v548_v24  ;;  %1943 = vmatprep.subr.bf16.mxu1 %v548_v24 }
  0xb7   : > { %1696 = vmatpush3.bf16.msra.mxu0 %v540_v25  ;;  %1951 = vmatpush3.bf16.msra.mxu1 %v540_v25 }
  0xb8   : > { %1697 = vmatprep.subr.bf16.mxu0 %v549_v26  ;;  %1944 = vmatprep.subr.bf16.mxu1 %v549_v26 }
  0xbb   : > { %1698 = vmatpush3.bf16.msra.mxu0 %v541_v27  ;;  %1952 = vmatpush3.bf16.msra.mxu1 %v541_v27 }
  0xbc   : > { %1699 = vmatprep.subr.bf16.mxu0 %v550_v28  ;;  %1945 = vmatprep.subr.bf16.mxu1 %v550_v28 }
  0xbf   : > { %1700 = vmatpush3.bf16.msra.mxu0 %v542_v29  ;;  %1953 = vmatpush3.bf16.msra.mxu1 %v542_v29 }
  0xc0   : > { %1701 = vmatprep.subr.bf16.mxu0 %v551_v30  ;;  %1946 = vmatprep.subr.bf16.mxu1 %v551_v30 }
  0xc3   : > { %1702 = vmatpush3.bf16.msra.mxu0 %v543_v31  ;;  %1954 = vmatpush3.bf16.msra.mxu1 %v543_v31 }
  0xc4   : > { %1703 = vmatprep.subr.bf16.mxu0 %v552_v32  ;;  %1947 = vmatprep.subr.bf16.mxu1 %v552_v32 }
  0xc7   : > { %1704 = vmatpush3.bf16.msra.mxu0 %v544_v33  ;;  %1955 = vmatpush3.bf16.msra.mxu1 %v544_v33 }
  0xc8   : > { %1860 = vmatprep.subr.bf16.mxu1 %v2117_v34 }
  0xca   : > { %783 = vmatmul.mubr.bf16.vlgmr.msra.gmra.mrb[0].mxu0 %v2069_v35  ;;  %879 = vmatmul.mubr.bf16.vlgmr.msra.gmra.mrb[0].mxu1 %v2099_v36 }
  0xcb   : > { %790 = vmatprep.mubr.bf16.mxu0 %v2072_v37  ;;  %886 = vmatprep.mubr.bf16.mxu1 %v2105_v38 }
  0xcc   : > { %1861 = vmatpush3.bf16.msra.mxu1 %v2117_v34 }
  0xcd   : > { %1862 = vmatprep.subr.bf16.mxu1 %v2118_v39 }
  0xd0   : > { %1863 = vmatpush3.bf16.msra.mxu1 %v2118_v39 }
  0xd1   : > { %1864 = vmatprep.subr.bf16.mxu1 %v2119_v40 }
  0xd2   : > { %791 = vmatmul.mubr.bf16.gmra.mrb[4].mxu0 %v2074_v41  ;;  %887 = vmatmul.mubr.bf16.gmra.mrb[4].mxu1 %v2107_v42 }
  0xd3   : > { %798 = vmatprep.mubr.bf16.mxu0 %v2075_v43  ;;  %894 = vmatprep.mubr.bf16.mxu1 %v2111_v44 }
  0xd4   : > { %1865 = vmatpush3.bf16.msra.mxu1 %v2119_v40 }
  0xd5   : > { %1866 = vmatprep.subr.bf16.mxu1 %v2120_v45 }
  0xd8   : > { %1867 = vmatpush3.bf16.msra.mxu1 %v2120_v45 }
  0xd9   : > { %1868 = vmatprep.subr.bf16.mxu1 %v2121_v3 }
  0xda   : > { %799 = vmatmul.mubr.bf16.gmra.mrb[8].mxu0 %v2077_v46  ;;  %895 = vmatmul.mubr.bf16.gmra.mrb[8].mxu1 %v2113_v47 }
  0xdb   : > { %806 = vmatprep.mubr.bf16.mxu0 %v2078_v48  ;;  %902 = vmatprep.mubr.bf16.mxu1 %v2114_v49 }
  0xdc   : > { %1869 = vmatpush3.bf16.msra.mxu1 %v2121_v3 }
  0xdd   : > { %1870 = vmatprep.subr.bf16.mxu1 %v2122_v5 }
  0xe0   : > { %1871 = vmatpush3.bf16.msra.mxu1 %v2122_v5 }
  0xe1   : > { %1872 = vmatprep.subr.bf16.mxu1 %v2123_v6 }
  0xe2   : > { %807 = vmatmul.mubr.bf16.gmra.mrb[12].mxu0 %v2080_v50  ;;  %903 = vmatmul.mubr.bf16.gmra.mrb[12].mxu1 %v2116_v51 }
  0xe3   : > { %814 = vmatprep.mubr.bf16.mxu0 %v2081_v52 }
  0xe4   : > { %1873 = vmatpush3.bf16.msra.mxu1 %v2123_v6 }
  0xe5   : > { %1874 = vmatprep.subr.bf16.mxu1 %v2124_v7 }
  0xe8   : > { %1875 = vmatpush3.bf16.msra.mxu1 %v2124_v7 }
  0xea   : > { %815 = vmatmul.mubr.bf16.gmra.mrb[16].mxu0 %v2083_v53 }
  0xeb   : > { %822 = vmatprep.mubr.bf16.mxu0 %v2084_v54 }
  0xf2   : > { %823 = vmatmul.mubr.bf16.gmra.mrb[20].mxu0 %v2086_v55 }
  0xf3   : > { %830 = vmatprep.mubr.bf16.mxu0 %v2087_v56 }
  0xfa   : > { %831 = vmatmul.mubr.bf16.gmra.mrb[24].mxu0 %v2089_v57 }
  0xfb   : > { %838 = vmatprep.mubr.bf16.mxu0 %v2090_v58 }
 0x102   : > { %839 = vmatmul.mubr.bf16.gmra.mrb[28].mxu0 %v2092_v59 }
 0x103   : > { %846 = vmatprep.mubr.bf16.mxu0 %v2093_v60 }
 0x10a   : > { %847 = vmatmul.mubr.bf16.gmra.mrb[32].mxu0 %v2095_v61 }
 0x10b   : > { %854 = vmatprep.mubr.bf16.mxu0 %v2096_v62 }
 0x112   : > { %855 = vmatmul.mubr.bf16.gmra.mrb[36].mxu0 %v2098_v63 }
 0x113   : > { %862 = vmatprep.mubr.bf16.mxu0 %v2102_v0 }
 0x11a   : > { %863 = vmatmul.mubr.bf16.gmra.mrb[40].mxu0 %v2104_v1 }
 0x11b   : > { %870 = vmatprep.mubr.bf16.mxu0 %v2108_v2 }
 0x122   : > { %871 = vmatmul.mubr.bf16.gmra.mrb[44].mxu0 %v2110_v4 }
 0x19d   : > { %v1705_v8 = vpop.f32.mrb[0].mxu0  ;;  %v1777_v9 = vpop.f32.mrb[0].mxu1 }
 0x19e   : > { %v1706_v10 = vpop.f32.mrb[1].mxu0  ;;  %v1778_v11 = vpop.f32.mrb[1].mxu1 }
 0x19f   : > { %v1707_v12 = vadd.f32 %v1706_v10, %v1705_v8  ;;  %v1708_v13 = vpop.f32.mrb[2].mxu0  ;;  %v2629_v14 = vadd.f32 %v1778_v11, %v1777_v9  ;;  %v1780_v15 = vpop.f32.mrb[2].mxu1 }
 0x1a0   : > { %v1709_v16 = vpop.f32.mrb[3].mxu0  ;;  %v1781_v17 = vpop.f32.mrb[3].mxu1 }
 0x1a1   : > { %v1710_v18 = vadd.f32 %v1709_v16, %v1708_v13  ;;  %v2631_v19 = vadd.f32 %v1781_v17, %v1780_v15 }
 0x1a3   : > { %v911_v20 = vpack.c.bf16 %v1710_v18, %v1707_v12  ;;  %v923_v21 = vpack.c.bf16 %v2631_v19, %v2629_v14 }
 0x1a5   : > { %v1711_v22 = vpop.f32.mrb[4].mxu0  ;;  %1876 = vmatprep.mubr.bf16.mxu1 %v911_v20  ;;  %v1783_v23 = vpop.f32.mrb[4].mxu1 }
 0x1a6   : > { %v1712_v24 = vpop.f32.mrb[5].mxu0  ;;  %v1784_v25 = vpop.f32.mrb[5].mxu1 }
 0x1a7   : > { %v1713_v26 = vadd.f32 %v1712_v24, %v1711_v22  ;;  %v1714_v27 = vpop.f32.mrb[6].mxu0  ;;  %v2635_v28 = vadd.f32 %v1784_v25, %v1783_v23  ;;  %v1786_v29 = vpop.f32.mrb[6].mxu1 }
 0x1a8   : > { %v1715_v30 = vpop.f32.mrb[7].mxu0  ;;  %v1787_v31 = vpop.f32.mrb[7].mxu1 }
 0x1a9   : > { %v1716_v32 = vadd.f32 %v1715_v30, %v1714_v27  ;;  %v2637_v33 = vadd.f32 %v1787_v31, %v1786_v29 }
 0x1ab   : > { %v912_v34 = vpack.c.bf16 %v1716_v32, %v1713_v26  ;;  %v924_v35 = vpack.c.bf16 %v2637_v33, %v2635_v28 }
 0x1ad   : > { %v1717_v36 = vpop.f32.mrb[8].mxu0  ;;  %1877 = vmatmul.mubr.bf16.vlgmr.msra.gmra.mrb[16].mxu1 %v912_v34  ;;  %v1789_v37 = vpop.f32.mrb[8].mxu1 }
 0x1ae   : > { %v1718_v38 = vpop.f32.mrb[9].mxu0  ;;  %v1790_v39 = vpop.f32.mrb[9].mxu1 }
 0x1af   : > { %v1719_v40 = vadd.f32 %v1718_v38, %v1717_v36  ;;  %v1720_v41 = vpop.f32.mrb[10].mxu0  ;;  %v2641_v42 = vadd.f32 %v1790_v39, %v1789_v37  ;;  %v1792_v43 = vpop.f32.mrb[10].mxu1 }
 0x1b0   : > { %v1721_v44 = vpop.f32.mrb[11].mxu0  ;;  %v1793_v45 = vpop.f32.mrb[11].mxu1 }
 0x1b1   : > { %v1722_v46 = vadd.f32 %v1721_v44, %v1720_v41  ;;  %v2643_v47 = vadd.f32 %v1793_v45, %v1792_v43 }
 0x1b3   : > { %v913_v48 = vpack.c.bf16 %v1722_v46, %v1719_v40  ;;  %v925_v49 = vpack.c.bf16 %v2643_v47, %v2641_v42 }
 0x1b5   : > { %v1723_v50 = vpop.f32.mrb[12].mxu0  ;;  %1880 = vmatprep.mubr.bf16.mxu1 %v913_v48  ;;  %v1795_v51 = vpop.f32.mrb[12].mxu1 }
 0x1b6   : > { %v1724_v52 = vpop.f32.mrb[13].mxu0  ;;  %v1796_v53 = vpop.f32.mrb[13].mxu1 }
 0x1b7   : > { %v1725_v54 = vadd.f32 %v1724_v52, %v1723_v50  ;;  %v1726_v55 = vpop.f32.mrb[14].mxu0  ;;  %v2647_v56 = vadd.f32 %v1796_v53, %v1795_v51  ;;  %v1798_v57 = vpop.f32.mrb[14].mxu1 }
 0x1b8   : > { %v1727_v58 = vpop.f32.mrb[15].mxu0  ;;  %v1799_v59 = vpop.f32.mrb[15].mxu1 }
 0x1b9   : > { %v1728_v60 = vadd.f32 %v1727_v58, %v1726_v55  ;;  %v2649_v61 = vadd.f32 %v1799_v59, %v1798_v57 }
 0x1bb   : > { %v914_v62 = vpack.c.bf16 %v1728_v60, %v1725_v54  ;;  %v926_v63 = vpack.c.bf16 %v2649_v61, %v2647_v56 }
 0x1bd   : > { %v1729_v0 = vpop.f32.mrb[16].mxu0  ;;  %1881 = vmatmul.mubr.bf16.gmra.mrb[20].mxu1 %v914_v62 }
 0x1be   : > { %v1730_v1 = vpop.f32.mrb[17].mxu0 }
 0x1bf   : > { %v1731_v2 = vadd.f32 %v1730_v1, %v1729_v0  ;;  %v1732_v3 = vpop.f32.mrb[18].mxu0 }
 0x1c0   : > { %v1733_v4 = vpop.f32.mrb[19].mxu0 }
 0x1c1   : > { %v1734_v5 = vadd.f32 %v1733_v4, %v1732_v3  ;;  %v2670_v4 = vld [vmem:[%s359_s12] ss:$0 sm:$0xff] }
 0x1c3   : > { %v915_v6 = vpack.c.bf16 %v1734_v5, %v1731_v2 }
 0x1c5   : > { %v1735_v7 = vpop.f32.mrb[20].mxu0  ;;  %1884 = vmatprep.mubr.bf16.mxu1 %v915_v6 }
 0x1c6   : > { %v1736_v8 = vpop.f32.mrb[21].mxu0 }
 0x1c7   : > { %v1737_v9 = vadd.f32 %v1736_v8, %v1735_v7  ;;  %v1738_v10 = vpop.f32.mrb[22].mxu0 }
 0x1c8   : > { %v1739_v11 = vpop.f32.mrb[23].mxu0 }
 0x1c9   : > { %v1740_v12 = vadd.f32 %v1739_v11, %v1738_v10 }
 0x1cb   : > { %v916_v13 = vpack.c.bf16 %v1740_v12, %v1737_v9 }
 0x1cd   : > { %v1741_v15 = vpop.f32.mrb[24].mxu0  ;;  %1885 = vmatmul.mubr.bf16.gmra.mrb[24].mxu1 %v916_v13 }
 0x1ce   : > { %v1742_v16 = vpop.f32.mrb[25].mxu0 }
 0x1cf   : > { %v1743_v17 = vadd.f32 %v1742_v16, %v1741_v15  ;;  %v1744_v18 = vpop.f32.mrb[26].mxu0 }
 0x1d0   : > { %v1745_v20 = vpop.f32.mrb[27].mxu0 }
 0x1d1   : > { %v1746_v22 = vadd.f32 %v1745_v20, %v1744_v18 }
 0x1d3   : > { %v917_v23 = vpack.c.bf16 %v1746_v22, %v1743_v17 }
 0x1d5   : > { %v1747_v24 = vpop.f32.mrb[28].mxu0  ;;  %1888 = vmatprep.mubr.bf16.mxu1 %v917_v23 }
 0x1d6   : > { %v1748_v25 = vpop.f32.mrb[29].mxu0 }
 0x1d7   : > { %v1749_v26 = vadd.f32 %v1748_v25, %v1747_v24  ;;  %v1750_v27 = vpop.f32.mrb[30].mxu0 }
 0x1d8   : > { %v1751_v29 = vpop.f32.mrb[31].mxu0 }
 0x1d9   : > { %v1752_v30 = vadd.f32 %v1751_v29, %v1750_v27 }
 0x1db   : > { %v918_v31 = vpack.c.bf16 %v1752_v30, %v1749_v26 }
 0x1dd   : > { %v1753_v32 = vpop.f32.mrb[32].mxu0  ;;  %1889 = vmatmul.mubr.bf16.gmra.mrb[28].mxu1 %v918_v31 }
 0x1de   : > { %v1754_v34 = vpop.f32.mrb[33].mxu0 }
 0x1df   : > { %v1755_v36 = vadd.f32 %v1754_v34, %v1753_v32  ;;  %v1756_v37 = vpop.f32.mrb[34].mxu0 }
 0x1e0   : > { %v1757_v38 = vpop.f32.mrb[35].mxu0 }
 0x1e1   : > { %v1758_v39 = vadd.f32 %v1757_v38, %v1756_v37 }
 0x1e3   : > { %v919_v40 = vpack.c.bf16 %v1758_v39, %v1755_v36 }
 0x1e5   : > { %v1759_v41 = vpop.f32.mrb[36].mxu0  ;;  %1892 = vmatprep.mubr.bf16.mxu1 %v919_v40 }
 0x1e6   : > { %v1760_v43 = vpop.f32.mrb[37].mxu0 }
 0x1e7   : > { %v1761_v44 = vadd.f32 %v1760_v43, %v1759_v41  ;;  %v1762_v45 = vpop.f32.mrb[38].mxu0 }
 0x1e8   : > { %v1763_v46 = vpop.f32.mrb[39].mxu0 }
 0x1e9   : > { %v1764_v48 = vadd.f32 %v1763_v46, %v1762_v45 }
 0x1eb   : > { %v920_v50 = vpack.c.bf16 %v1764_v48, %v1761_v44 }
 0x1ed   : > { %v1765_v51 = vpop.f32.mrb[40].mxu0  ;;  %1893 = vmatmul.mubr.bf16.gmra.mrb[32].mxu1 %v920_v50 }
 0x1ee   : > { %v1766_v52 = vpop.f32.mrb[41].mxu0 }
 0x1ef   : > { %v1767_v53 = vadd.f32 %v1766_v52, %v1765_v51  ;;  %v1768_v54 = vpop.f32.mrb[42].mxu0 }
 0x1f0   : > { %v1769_v55 = vpop.f32.mrb[43].mxu0 }
 0x1f1   : > { %v1770_v57 = vadd.f32 %v1769_v55, %v1768_v54 }
 0x1f3   : > { %v921_v58 = vpack.c.bf16 %v1770_v57, %v1767_v53 }
 0x1f5   : > { %v1771_v59 = vpop.f32.mrb[44].mxu0  ;;  %1896 = vmatprep.mubr.bf16.mxu1 %v921_v58 }
 0x1f6   : > { %v1772_v60 = vpop.f32.mrb[45].mxu0 }
 0x1f7   : > { %v1773_v62 = vadd.f32 %v1772_v60, %v1771_v59  ;;  %v1774_v0 = vpop.f32.mrb[46].mxu0 }
 0x1f8   : > { %v1775_v1 = vpop.f32.mrb[47].mxu0 }
 0x1f9   : > { %v1776_v2 = vadd.f32 %v1775_v1, %v1774_v0 }
 0x1fb   : > { %v922_v3 = vpack.c.bf16 %v1776_v2, %v1773_v62 }
 0x1fd   : > { %1897 = vmatmul.mubr.bf16.gmra.mrb[36].mxu1 %v922_v3 }
 0x1fe   : > { %1900 = vmatprep.mubr.bf16.mxu1 %v923_v21 }
 0x205   : > { %1901 = vmatmul.mubr.bf16.gmra.mrb[40].mxu1 %v924_v35 }
 0x206   : > { %1904 = vmatprep.mubr.bf16.mxu1 %v925_v49 }
 0x20d   : > { %1905 = vmatmul.mubr.bf16.gmra.mrb[44].mxu1 %v926_v63 }
 0x280   : > { %v1878_v14 = vpop.f32.mrb[16].mxu1 }
 0x281   : > { %v1041_v19 = vadd.f32 %v1878_v14, %v2670_v4  ;;  %v1032_v21 = vpop.f32.mrb[17].mxu1 }
 0x282   : > { %v1033_v28 = vadd.f32 %v2670_v4, %v1032_v21  ;;  %v1879_v33 = vpop.f32.mrb[18].mxu1 }
 0x283   : > { %v1044_v35 = vadd.f32 %v1879_v33, %v2670_v4  ;;  %v1035_v42 = vpop.f32.mrb[19].mxu1  ;;  %v1161_v49 = vmax.f32 %v1041_v19, 0.0 }
 0x284   : > { %v1036_v47 = vadd.f32 %v2670_v4, %v1035_v42  ;;  %v1159_v63 = vmax.f32 %v1033_v28, 0.0 }
 0x285   : > { %v1162_v56 = vmax.f32 %v1044_v35, 0.0  ;;  %v2676_v61 = vpack.c.bf16 %v1044_v35, %v1041_v19 }
 0x286   : > { %v1160_v5 = vmax.f32 %v1036_v47, 0.0  ;;  %v2678_v6 = vpack.c.bf16 %v1036_v47, %v1033_v28 }
 0x287   : > { %v2680_v7 = vpack.c.bf16 %v1162_v56, %v1161_v49 }
 0x288   : > { %v2682_v8 = vpack.c.bf16 %v1160_v5, %v1159_v63 }
 0x289   : > { %1648 = vst [vmem:[#allocation2 + $0x88] sm:$0xff] (!%p1646_p7), %v2680_v7 }
 0x28a   : > { %1647 = vst [vmem:[#allocation2 + $0x80] sm:$0xff] (!%p1646_p7), %v2682_v8 }
 0x290   : > { %v1882_v9 = vpop.f32.mrb[20].mxu1 }
 0x291   : > { %v1057_v10 = vadd.f32 %v1882_v9, %v2670_v4  ;;  %v1048_v11 = vpop.f32.mrb[21].mxu1 }
 0x292   : > { %v1049_v12 = vadd.f32 %v2670_v4, %v1048_v11  ;;  %v1883_v13 = vpop.f32.mrb[22].mxu1 }
 0x293   : > { %v1060_v15 = vadd.f32 %v1883_v13, %v2670_v4  ;;  %v1051_v16 = vpop.f32.mrb[23].mxu1  ;;  %v1165_v18 = vmax.f32 %v1057_v10, 0.0 }
 0x294   : > { %v1052_v17 = vadd.f32 %v2670_v4, %v1051_v16  ;;  %v1163_v23 = vmax.f32 %v1049_v12, 0.0 }
 0x295   : > { %v1166_v20 = vmax.f32 %v1060_v15, 0.0  ;;  %v2688_v22 = vpack.c.bf16 %v1060_v15, %v1057_v10 }
 0x296   : > { %v1164_v24 = vmax.f32 %v1052_v17, 0.0  ;;  %v2690_v25 = vpack.c.bf16 %v1052_v17, %v1049_v12 }
 0x297   : > { %v2692_v26 = vpack.c.bf16 %v1166_v20, %v1165_v18 }
 0x298   : > { %v2694_v27 = vpack.c.bf16 %v1164_v24, %v1163_v23 }
 0x299   : > { %1650 = vst [vmem:[#allocation2 + $0x98] sm:$0xff] (!%p1646_p7), %v2692_v26 }
 0x29a   : > { %1649 = vst [vmem:[#allocation2 + $0x90] sm:$0xff] (!%p1646_p7), %v2694_v27 }
 0x2a0   : > { %v1886_v29 = vpop.f32.mrb[24].mxu1 }
 0x2a1   : > { %v1073_v30 = vadd.f32 %v1886_v29, %v2670_v4  ;;  %v1064_v31 = vpop.f32.mrb[25].mxu1 }
 0x2a2   : > { %v1065_v32 = vadd.f32 %v2670_v4, %v1064_v31  ;;  %v1887_v34 = vpop.f32.mrb[26].mxu1 }
 0x2a3   : > { %v1076_v36 = vadd.f32 %v1887_v34, %v2670_v4  ;;  %v1067_v37 = vpop.f32.mrb[27].mxu1  ;;  %v1169_v39 = vmax.f32 %v1073_v30, 0.0 }
 0x2a4   : > { %v1068_v38 = vadd.f32 %v2670_v4, %v1067_v37  ;;  %v1167_v43 = vmax.f32 %v1065_v32, 0.0 }
 0x2a5   : > { %v1170_v40 = vmax.f32 %v1076_v36, 0.0  ;;  %v2700_v41 = vpack.c.bf16 %v1076_v36, %v1073_v30 }
 0x2a6   : > { %v1168_v44 = vmax.f32 %v1068_v38, 0.0  ;;  %v2702_v45 = vpack.c.bf16 %v1068_v38, %v1065_v32 }
 0x2a7   : > { %v2704_v46 = vpack.c.bf16 %v1170_v40, %v1169_v39 }
 0x2a8   : > { %v2706_v48 = vpack.c.bf16 %v1168_v44, %v1167_v43 }
 0x2a9   : > { %1652 = vst [vmem:[#allocation2 + $0xa8] sm:$0xff] (!%p1646_p7), %v2704_v46 }
 0x2aa   : > { %1651 = vst [vmem:[#allocation2 + $0xa0] sm:$0xff] (!%p1646_p7), %v2706_v48 }
 0x2b0   : > { %v1890_v50 = vpop.f32.mrb[28].mxu1 }
 0x2b1   : > { %v1089_v51 = vadd.f32 %v1890_v50, %v2670_v4  ;;  %v1080_v52 = vpop.f32.mrb[29].mxu1 }
 0x2b2   : > { %v1081_v53 = vadd.f32 %v2670_v4, %v1080_v52  ;;  %v1891_v54 = vpop.f32.mrb[30].mxu1 }
 0x2b3   : > { %v1092_v55 = vadd.f32 %v1891_v54, %v2670_v4  ;;  %v1083_v57 = vpop.f32.mrb[31].mxu1  ;;  %v1173_v59 = vmax.f32 %v1089_v51, 0.0 }
 0x2b4   : > { %v1084_v58 = vadd.f32 %v2670_v4, %v1083_v57  ;;  %v1171_v0 = vmax.f32 %v1081_v53, 0.0 }
 0x2b5   : > { %v1174_v60 = vmax.f32 %v1092_v55, 0.0  ;;  %v2712_v62 = vpack.c.bf16 %v1092_v55, %v1089_v51 }
 0x2b6   : > { %v1172_v1 = vmax.f32 %v1084_v58, 0.0  ;;  %v2714_v2 = vpack.c.bf16 %v1084_v58, %v1081_v53 }
 0x2b7   : > { %v2716_v3 = vpack.c.bf16 %v1174_v60, %v1173_v59 }
 0x2b8   : > { %v2718_v14 = vpack.c.bf16 %v1172_v1, %v1171_v0 }
 0x2b9   : > { %1654 = vst [vmem:[#allocation2 + $0xb8] sm:$0xff] (!%p1646_p7), %v2716_v3 }
 0x2ba   : > { %1653 = vst [vmem:[#allocation2 + $0xb0] sm:$0xff] (!%p1646_p7), %v2718_v14 }
 0x2c0   : > { %v1894_v19 = vpop.f32.mrb[32].mxu1 }
 0x2c1   : > { %v1105_v21 = vadd.f32 %v1894_v19, %v2670_v4  ;;  %v1096_v28 = vpop.f32.mrb[33].mxu1 }
 0x2c2   : > { %v1097_v33 = vadd.f32 %v2670_v4, %v1096_v28  ;;  %v1895_v35 = vpop.f32.mrb[34].mxu1 }
 0x2c3   : > { %v1108_v42 = vadd.f32 %v1895_v35, %v2670_v4  ;;  %v1099_v47 = vpop.f32.mrb[35].mxu1  ;;  %v1177_v56 = vmax.f32 %v1105_v21, 0.0 }
 0x2c4   : > { %v1100_v49 = vadd.f32 %v2670_v4, %v1099_v47  ;;  %v1175_v9 = vmax.f32 %v1097_v33, 0.0 }
 0x2c5   : > { %v1178_v63 = vmax.f32 %v1108_v42, 0.0  ;;  %v2724_v5 = vpack.c.bf16 %v1108_v42, %v1105_v21 }
 0x2c6   : > { %v1176_v10 = vmax.f32 %v1100_v49, 0.0  ;;  %v2726_v11 = vpack.c.bf16 %v1100_v49, %v1097_v33 }
 0x2c7   : > { %v2728_v12 = vpack.c.bf16 %v1178_v63, %v1177_v56 }
 0x2c8   : > { %v2730_v13 = vpack.c.bf16 %v1176_v10, %v1175_v9 }
 0x2c9   : > { %1656 = vst [vmem:[#allocation2 + $0xc8] sm:$0xff] (!%p1646_p7), %v2728_v12 }
 0x2ca   : > { %1655 = vst [vmem:[#allocation2 + $0xc0] sm:$0xff] (!%p1646_p7), %v2730_v13 }
 0x2d0   : > { %v1898_v15 = vpop.f32.mrb[36].mxu1 }
 0x2d1   : > { %v1121_v16 = vadd.f32 %v1898_v15, %v2670_v4  ;;  %v1112_v17 = vpop.f32.mrb[37].mxu1 }
 0x2d2   : > { %v1113_v18 = vadd.f32 %v2670_v4, %v1112_v17  ;;  %v1899_v20 = vpop.f32.mrb[38].mxu1 }
 0x2d3   : > { %v1124_v23 = vadd.f32 %v1899_v20, %v2670_v4  ;;  %v1115_v24 = vpop.f32.mrb[39].mxu1  ;;  %v1181_v30 = vmax.f32 %v1121_v16, 0.0 }
 0x2d4   : > { %v1116_v29 = vadd.f32 %v2670_v4, %v1115_v24  ;;  %v1179_v34 = vmax.f32 %v1113_v18, 0.0 }
 0x2d5   : > { %v1182_v31 = vmax.f32 %v1124_v23, 0.0  ;;  %v2736_v32 = vpack.c.bf16 %v1124_v23, %v1121_v16 }
 0x2d6   : > { %v1180_v36 = vmax.f32 %v1116_v29, 0.0  ;;  %v2738_v37 = vpack.c.bf16 %v1116_v29, %v1113_v18 }
 0x2d7   : > { %v2740_v38 = vpack.c.bf16 %v1182_v31, %v1181_v30 }
 0x2d8   : > { %v2742_v39 = vpack.c.bf16 %v1180_v36, %v1179_v34  ;;  %v1902_v40 = vpop.f32.mrb[40].mxu1 }
 0x2d9   : > { %v1137_v43 = vadd.f32 %v1902_v40, %v2670_v4  ;;  %v1128_v44 = vpop.f32.mrb[41].mxu1  ;;  %1658 = vst [vmem:[#allocation2 + $0xd8] sm:$0xff] (!%p1646_p7), %v2740_v38 }
 0x2da   : > { %v1129_v50 = vadd.f32 %v2670_v4, %v1128_v44  ;;  %v1903_v51 = vpop.f32.mrb[42].mxu1  ;;  %1657 = vst [vmem:[#allocation2 + $0xd0] sm:$0xff] (!%p1646_p7), %v2742_v39 }
 0x2db   : > { %v1140_v52 = vadd.f32 %v1903_v51, %v2670_v4  ;;  %v1131_v53 = vpop.f32.mrb[43].mxu1  ;;  %v1185_v55 = vmax.f32 %v1137_v43, 0.0 }
 0x2dc   : > { %v1132_v54 = vadd.f32 %v2670_v4, %v1131_v53  ;;  %v1183_v59 = vmax.f32 %v1129_v50, 0.0 }
 0x2dd   : > { %v1186_v57 = vmax.f32 %v1140_v52, 0.0  ;;  %v2748_v58 = vpack.c.bf16 %v1140_v52, %v1137_v43 }
 0x2de   : > { %v1184_v60 = vmax.f32 %v1132_v54, 0.0  ;;  %v2750_v0 = vpack.c.bf16 %v1132_v54, %v1129_v50 }
 0x2df   : > { %v1204_v1 = vpack.c.bf16 %v1186_v57, %v1185_v55 }
 0x2e0   : > { %v1203_v19 = vpack.c.bf16 %v1184_v60, %v1183_v59  ;;  %v1906_v21 = vpop.f32.mrb[44].mxu1 }
 0x2e1   : > { %v1153_v28 = vadd.f32 %v1906_v21, %v2670_v4  ;;  %v1144_v33 = vpop.f32.mrb[45].mxu1  ;;  %1660 = vst [vmem:[#allocation2 + $0xe8] sm:$0xff] (!%p1646_p7), %v1204_v1 }
 0x2e2   : > { %v1145_v35 = vadd.f32 %v2670_v4, %v1144_v33  ;;  %v1907_v42 = vpop.f32.mrb[46].mxu1  ;;  %1226 = sbr.rel (%p1646_p7) target bundleno = 747 (0x2eb), region = 68  ;;  %1659 = vst [vmem:[#allocation2 + $0xe0] sm:$0xff] (!%p1646_p7), %v1203_v19 }
 0x2e3   : > { %v1156_v47 = vadd.f32 %v1907_v42, %v2670_v4  ;;  %v1147_v49 = vpop.f32.mrb[47].mxu1  ;;  %v1189_v63 = vmax.f32 %v1153_v28, 0.0 }
 0x2e4   : > { %v1148_v56 = vadd.f32 %v2670_v4, %v1147_v49  ;;  %v1187_v15 = vmax.f32 %v1145_v35, 0.0 }
 0x2e5   : > { %v1190_v9 = vmax.f32 %v1156_v47, 0.0  ;;  %v2756_v10 = vpack.c.bf16 %v1156_v47, %v1153_v28 }
 0x2e6   : > { %v1188_v16 = vmax.f32 %v1148_v56, 0.0  ;;  %v2758_v17 = vpack.c.bf16 %v1148_v56, %v1145_v35 }
 0x2e7   : > { %v1206_v18 = vpack.c.bf16 %v1190_v9, %v1189_v63 }
 0x2e8   : > { %v1205_v20 = vpack.c.bf16 %v1188_v16, %v1187_v15 }
 0x2e9   : > { %1662 = vst [vmem:[#allocation2 + $0xf8] sm:$0xff] %v1206_v18 }
 0x2ea   : > { %1661 = vst [vmem:[#allocation2 + $0xf0] sm:$0xff] %v1205_v20 }
 0x2eb PF: > { %p1663_p11 = scmp.ne.s32.totalorder %s2325_s21, 2 }
 0x2ec   : > { %1256 = vst [vmem:[#allocation2] sm:$0xff] (!%p1663_p11), %v2682_v8  ;;  %1257 = vst [vmem:[#allocation2 + $0x8] sm:$0xff] (!%p1663_p11), %v2680_v7 }
 0x2ed   : > { %1251 = sbr.rel (%p1663_p11) target bundleno = 756 (0x2f4), region = 72  ;;  %1258 = vst [vmem:[#allocation2 + $0x10] sm:$0xff] (!%p1663_p11), %v2694_v27  ;;  %1259 = vst [vmem:[#allocation2 + $0x18] sm:$0xff] (!%p1663_p11), %v2692_v26 }
 0x2ee   : > { %1260 = vst [vmem:[#allocation2 + $0x20] sm:$0xff] (!%p1663_p11), %v2706_v48  ;;  %1261 = vst [vmem:[#allocation2 + $0x28] sm:$0xff] (!%p1663_p11), %v2704_v46 }
 0x2ef   : > { %1262 = vst [vmem:[#allocation2 + $0x30] sm:$0xff] (!%p1663_p11), %v2718_v14  ;;  %1263 = vst [vmem:[#allocation2 + $0x38] sm:$0xff] (!%p1663_p11), %v2716_v3 }
 0x2f0   : > { %1264 = vst [vmem:[#allocation2 + $0x40] sm:$0xff] (!%p1663_p11), %v2730_v13  ;;  %1265 = vst [vmem:[#allocation2 + $0x48] sm:$0xff] (!%p1663_p11), %v2728_v12 }
 0x2f1   : > { %1266 = vst [vmem:[#allocation2 + $0x50] sm:$0xff] (!%p1663_p11), %v2742_v39  ;;  %1267 = vst [vmem:[#allocation2 + $0x58] sm:$0xff] (!%p1663_p11), %v2740_v38 }
 0x2f2   : > { %1268 = vst [vmem:[#allocation2 + $0x60] sm:$0xff] (!%p1663_p11), %v1203_v19  ;;  %1269 = vst [vmem:[#allocation2 + $0x68] sm:$0xff] (!%p1663_p11), %v1204_v1 }
 0x2f3   : > { %1270 = vst [vmem:[#allocation2 + $0x70] sm:$0xff] (!%p1663_p11), %v1205_v20  ;;  %1271 = vst [vmem:[#allocation2 + $0x78] sm:$0xff] (!%p1663_p11), %v1206_v18 }
 0x2f4 PF: > { %p1664_p9 = scmp.ne.s32.totalorder %s2325_s21, 3 }
 0x2f5   : > { %1673 = vst [vmem:[#allocation2 + $0xc0] sm:$0xff] (!%p1664_p9), %v2726_v11  ;;  %1909 = vmatprep.subr.bf16.mxu0 (!%p1664_p9), %v2726_v11  ;;  %1665 = vst [vmem:[#allocation2 + $0x80] sm:$0xff] (!%p1664_p9), %v2678_v6  ;;  %v1351_v4 = vld [vmem:[#allocation9 + $0x8] sm:$0xff] (!%p1664_p9) }
 0x2f6   : > { %1275 = sbr.rel (%p1664_p9) target bundleno = 1164 (0x48c), region = 76  ;;  %1674 = vst [vmem:[#allocation2 + $0xc8] sm:$0xff] (!%p1664_p9), %v2724_v5  ;;  %1666 = vst [vmem:[#allocation2 + $0x88] sm:$0xff] (!%p1664_p9), %v2676_v61  ;;  %1911 = vmatpush3.bf16.msra.mxu0 (!%p1664_p9), %v2678_v6  ;;  %1416 = vmatprep.mubr.f32.mxu0 (!%p1664_p9), %v1351_v4 }
 0x2f7   : > { %1675 = vst [vmem:[#allocation2 + $0xd0] sm:$0xff] (!%p1664_p9), %v2738_v37  ;;  %1667 = vst [vmem:[#allocation2 + $0x90] sm:$0xff] (!%p1664_p9), %v2690_v25  ;;  %1913 = vmatprep.subr.bf16.mxu0 (!%p1664_p9), %v2724_v5 }
 0x2f8   : > { %1676 = vst [vmem:[#allocation2 + $0xd8] sm:$0xff] (!%p1664_p9), %v2736_v32  ;;  %1668 = vst [vmem:[#allocation2 + $0x98] sm:$0xff] (!%p1664_p9), %v2688_v22 }
 0x2f9   : > { %1677 = vst [vmem:[#allocation2 + $0xe0] sm:$0xff] (!%p1664_p9), %v2750_v0  ;;  %1669 = vst [vmem:[#allocation2 + $0xa0] sm:$0xff] (!%p1664_p9), %v2702_v45 }
 0x2fa   : > { %1678 = vst [vmem:[#allocation2 + $0xe8] sm:$0xff] (!%p1664_p9), %v2748_v58  ;;  %1670 = vst [vmem:[#allocation2 + $0xa8] sm:$0xff] (!%p1664_p9), %v2700_v41  ;;  %1915 = vmatpush3.bf16.msra.mxu0 (!%p1664_p9), %v2676_v61  ;;  %v1350_v61 = vld [vmem:[#allocation9] sm:$0xff] (!%p1664_p9) }
 0x2fb   : > { %1679 = vst [vmem:[#allocation2 + $0xf0] sm:$0xff] (!%p1664_p9), %v2758_v17  ;;  %1671 = vst [vmem:[#allocation2 + $0xb0] sm:$0xff] (!%p1664_p9), %v2714_v2  ;;  %1917 = vmatprep.subr.bf16.mxu0 (!%p1664_p9), %v2738_v37 }
 0x2fc   : > { %1680 = vst [vmem:[#allocation2 + $0xf8] sm:$0xff] (!%p1664_p9), %v2756_v10  ;;  %1672 = vst [vmem:[#allocation2 + $0xb8] sm:$0xff] (!%p1664_p9), %v2712_v62 }
 0x2fe   : > { %1919 = vmatpush3.bf16.msra.mxu0 %v2690_v25 }
 0x2ff   : > { %1921 = vmatprep.subr.bf16.mxu0 %v2736_v32 }
 0x302   : > { %1923 = vmatpush3.bf16.msra.mxu0 %v2688_v22 }
 0x303   : > { %1925 = vmatprep.subr.bf16.mxu0 %v2750_v0 }
 0x306   : > { %1927 = vmatpush3.bf16.msra.mxu0 %v2702_v45 }
 0x307   : > { %1929 = vmatprep.subr.bf16.mxu0 %v2748_v58 }
 0x30a   : > { %1931 = vmatpush3.bf16.msra.mxu0 %v2700_v41 }
 0x30b   : > { %1933 = vmatprep.subr.bf16.mxu0 %v2758_v17 }
 0x30e   : > { %1935 = vmatpush3.bf16.msra.mxu0 %v2714_v2 }
 0x30f   : > { %1937 = vmatprep.subr.bf16.mxu0 %v2756_v10 }
 0x312   : > { %1939 = vmatpush3.bf16.msra.mxu0 %v2712_v62 }
 0x315   : > { %1417 = vmatmul.mubr.f32.vlgmr.msra.gmra.mrb[0].mxu0 %v1350_v61 }
 0x3e8   : > { %v1857_v6 = vpop.f32.mrb[0].mxu0 }
 0x3e9   : > { %v1858_v7 = vpop.f32.mrb[1].mxu0 }
 0x3ea   : > { %v1859_v8 = vadd.f32 %v1858_v7, %v1857_v6 }
 0x3ec   : > { %v1422_v22 = vmul.f32 %v1859_v8, %v1859_v8 }
 0x3ee   : > { %1423 = vadd.xlane.f32.xlu0 %v1422_v22 }
 0x47b   : > { %v1424_v25 = vpop.xlane.xlu0 %1423 }
 0x47c   : > { %v1425_v26 = vmax.f32 %v1424_v25, 1e-24 }
 0x47e   : > { %2125 = vrsqrt.f32 %v1425_v26 }
 0x488   : > { %v2126_v27 = vpop.eup %2125 }
 0x489   : > { %v1427_v41 = vmul.f32 %v2126_v27, %v1859_v8 }
 0x48b   : > { %1428 = vst [vmem:[#allocation10] sm:$0xff] %v1427_v41 }
 0x48c PF: > { %p1995_p8 = scmp.eq.s32.totalorder %s2403_s24, 3  ;;  %s2343_s21 = smov [#allocation10]  }
 0x48d   : > { %s1436_s8 = sshll.u32 %s2343_s21, 4  ;;  %s1437_s8 = int_to_ptr.vmem [resolvable:$true] %s1436_s8 }
 0x48e   : > { %s2241_s26 = scalar_lea.vmem %s1437_s8, 128  ;;  %p2248_p1 = scmp.lt.s32.totalorder %s1437_s8, %s1437_s8 }
 0x48f   : > { %p2242_p6 = scmp.ne.s32.totalorder %s1437_s8, %s2241_s26  ;;  %p2249_p3 = scmp.lt.s32.totalorder %s2241_s26, %s2241_s26 }
 0x491   : > { %p2243_p12 = pnand %p2242_p6, %p1995_p8  ;;  %p2250_p4 = por %p2249_p3, %p2248_p1 }
 0x493   : > { %p2244_p10 = pneg %p2243_p12 }
 0x495   : > { %p2251_p2 = pnand %p2250_p4, %p2244_p10 }
 0x497   : > { %2254 = shalt.err (!%p2251_p2)
}
 0x498   : > { %s2255_s6 = scalar_lea.hbm %s2865_s5, 128 }
 0x499   : > { %p2256_p13 = scmp.ne.s32.totalorder %s2865_s5, %s2255_s6  ;;  %p2261_p7 = scmp.lt.u32.totalorder %s2255_s6, %s2865_s5 }
 0x49b   : > { %p2257_p0 = pnand %p2256_p13, %p1995_p8 }
 0x49d   : > { %p2258_p5 = pneg %p2257_p0 }
 0x49f   : > { %p2263_p11 = pnand %p2261_p7, %p2258_p5 }
 0x4a1   : > { %2266 = shalt.err (!%p2263_p11)
}
 0x4a2   : > { %1971 = dma.vmem_to_hbm [thread:$0]  (%p1995_p8), %s1437_s8, 128, %s2865_s5, [#allocation5]  }
 0x4a3   : > { %2308 = dma.done.wait (%p1995_p8), [#allocation5], 128  }
 0x4a4   : > { %2310 = vsyncadd (%p1995_p8), [#allocation5], 4294967168 }
 0x4a5 PF: > { %s20_s23 = sadd.s32 1, %s2333_s23   ;;  %s2898_s18 = smov %s2317_s19 }
 0x4a6   : > { %p17_p9 = scmp.ge.s32.totalorder %s20_s23, 6   ;;  %s2899_s19 = smov %s2321_s20 }
 0x4a7   : > { %s2900_s20 = smov %s2567_s14  ;;  %s2901_s21 = smov %s2329_s22 }
 0x4a8   : > { %s2902_s22 = smov %s2904_s9  ;;  %19 = sbr.rel (!%p17_p9) target bundleno = 6 (0x6), region = 130 }
 0x4af   :  { %1449 = vsyncpa [#allocation4], 1 }
 0x4b0   :  { %1451 = vsyncpa [#allocation4 + $0x1], 1 }
 0x4b1   :  { %1452 = vsyncpa [#allocation7], 1 }
 0x4b2   :  { %1453 = vsyncpa [#allocation5], 1 }
 0x4b3   :  { %1455 = vsyncpa [#allocation5 + $0x1], 1 }

</bundles_post_ra>
